<compile_context>
chip_gen: v7x
topology: tpu7x:2x2x1
jax: 0.10.0
libtpu: 0.0.40
codegen_flags: <defaults>
</compile_context>

<pallas_src>
import functools
import math

import jax
import jax.numpy as jnp
from jax import lax
from jax.experimental import pallas as pl
from jax.experimental.pallas import tpu as pltpu


NEG_INF = -1e30   # finite mask fill: avoids (-inf)-(-inf) NaNs; every row sees >=1 valid key


# ----------------------------- small helpers -----------------------------

def _erf(x):
    # Numerical-Recipes erfc rational approximation (|err| < 1.2e-7): keeps exact-erf GELU
    # semantics of torch.nn.functional.gelu; the single exp runs on the EUP.
    t = 1.0 / (1.0 + 0.5 * jnp.abs(x))
    poly = -1.26551223 + t * (1.00002368 + t * (0.37409196 + t * (0.09678418 +
           t * (-0.18628806 + t * (0.27886807 + t * (-1.13520398 + t * (1.48851587 +
           t * (-0.82215223 + t * 0.17087277))))))))
    tau = t * jnp.exp(-x * x + poly)
    return jnp.where(x >= 0.0, 1.0 - tau, tau - 1.0)


def _gelu_exact(x):
    # matches torch.nn.functional.gelu default (erf form)
    return 0.5 * x * (1.0 + _erf(x * (1.0 / math.sqrt(2.0))))


def _layernorm(h, gamma, beta, eps=1e-5):
    mu = jnp.mean(h, axis=-1, keepdims=True)
    var = jnp.mean(jnp.square(h - mu), axis=-1, keepdims=True)
    return (h - mu) * lax.rsqrt(var + eps) * gamma + beta


def _pick_tile(n, target, multiple):
    """Largest divisor of n that is <= target and a multiple of `multiple`; falls back to n."""
    if n <= target:
        return n
    for d in range(target, 0, -1):
        if n % d == 0 and d % multiple == 0:
            return d
    return n


@functools.lru_cache(maxsize=1)
def _vmem_limit_bytes():
    # generation-aware scoped-VMEM budget (~75% of physical); safe fallback if query fails
    try:
        cap = int(pltpu.get_tpu_info().vmem_capacity_bytes)
        return int(min(cap * 3 // 4, 512 * 1024 * 1024))
    except Exception:
        return 32 * 1024 * 1024


# --------------------- 1) LN1 + fused QKV projection kernel ---------------------
# grid = (B, n_token_tiles).  One full-width (tile, C) @ (C, 3C) MXU matmul per token tile,
# then per-head lane slices are written into head-major (B, n_head, T, hd) bf16 outputs
# (the relayout happens once per token, not per (q-tile, kv-tile) pair).

def qkv_proj_kernel(x_ref, g1_ref, b1_ref, wqkv_ref, bqkv_ref, q_ref, k_ref, v_ref):
    _, n_head, _, hd = q_ref.shape
    C = x_ref.shape[-1]
    x = x_ref[0].astype(jnp.float32)                              # (tile, C)
    h = _layernorm(x, g1_ref[...], b1_ref[...])
    qkv = jnp.dot(h.astype(jnp.bfloat16), wqkv_ref[...],
                  preferred_element_type=jnp.float32) + bqkv_ref[...]   # (tile, 3C)
    for hh in range(n_head):
        lo = hh * hd
        q_ref[0, hh] = qkv[:, lo:lo + hd].astype(q_ref.dtype)          # scale pre-folded in wq
        k_ref[0, hh] = qkv[:, C + lo:C + lo + hd].astype(k_ref.dtype)
        v_ref[0, hh] = qkv[:, 2 * C + lo:2 * C + lo + hd].astype(v_ref.dtype)


def _qkv_proj(x, p, n_head, *, tile, single_buffer, vmem_limit):
    B, T, C = x.shape
    hd = C // n_head
    n_t = T // tile

    def const_spec(arr, idx):
        if single_buffer:
            return pl.BlockSpec(arr.shape, idx, pipeline_mode=pl.Buffered(1))
        return pl.BlockSpec(arr.shape, idx)

    cidx = lambda b, i: (0, 0)
    out_shape = tuple(jax.ShapeDtypeStruct((B, n_head, T, hd), jnp.bfloat16) for _ in range(3))
    out_spec = pl.BlockSpec((1, n_head, tile, hd), lambda b, i: (b, 0, i, 0))

    return pl.pallas_call(
        qkv_proj_kernel,
        out_shape=out_shape,
        grid=(B, n_t),
        in_specs=[pl.BlockSpec((1, tile, C), lambda b, i: (b, i, 0)),
                  const_spec(p["ln1_g"], cidx), const_spec(p["ln1_b"], cidx),
                  const_spec(p["wqkv"], cidx), const_spec(p["bqkv"], cidx)],
        out_specs=(out_spec, out_spec, out_spec),
        compiler_params=pltpu.CompilerParams(
            dimension_semantics=("parallel", "parallel"),
            vmem_limit_bytes=vmem_limit),
    )(x, p["ln1_g"], p["ln1_b"], p["wqkv"], p["bqkv"])


# --------------------------- 2) flash attention kernel ---------------------------
# grid = (B, n_q, n_kv): kv axis is "arbitrary"; online softmax over blocked K/V tiles.
# Causal mask only on the diagonal tile; fully-masked tiles (kv > qi) are skipped
# (and their K/V DMA is elided by clamping the block index to min(kv, qi)).

def attn_kernel(x_ref, q_ref, k_ref, v_ref, wp_ref, bp_ref, o_ref,
                acc_ref, m_ref, l_ref, y_ref):
    _, n_head, tq, hd = q_ref.shape
    qi = pl.program_id(1)
    kv = pl.program_id(2)

    @pl.when(kv == 0)
    def _():
        m_ref[...] = jnp.full_like(m_ref, NEG_INF)
        l_ref[...] = jnp.zeros_like(l_ref)
        acc_ref[...] = jnp.zeros_like(acc_ref)

    def process(masked):
        q = q_ref[0]                         # (n_head, tq, hd) bf16, scale folded into weights
        k = k_ref[0]                         # (n_head, tk, hd) bf16
        v = v_ref[0]                         # (n_head, tk, hd) bf16
        s = lax.dot_general(q, k, (((2,), (2,)), ((0,), (0,))),
                            preferred_element_type=jnp.float32)       # (n_head, tq, tk)
        if masked:                           # diagonal tile only
            rows = lax.broadcasted_iota(jnp.int32, s.shape, 1)
            cols = lax.broadcasted_iota(jnp.int32, s.shape, 2)
            s = jnp.where(rows >= cols, s, NEG_INF)
        m_prev = m_ref[...]
        m_new = jnp.maximum(m_prev, jnp.max(s, axis=-1, keepdims=True))
        alpha = jnp.exp(m_prev - m_new)
        p = jnp.exp(s - m_new)                                         # attn_drop: identity (eval)
        l_ref[...] = alpha * l_ref[...] + jnp.sum(p, axis=-1, keepdims=True)
        acc_ref[...] = alpha * acc_ref[...] + lax.dot_general(
            p.astype(jnp.bfloat16), v, (((2,), (1,)), ((0,), (0,))),
            preferred_element_type=jnp.float32)
        m_ref[...] = m_new

    @pl.when(kv < qi)          # fully-unmasked causal tile: no iota / compare / select
    def _():
        process(masked=False)

    @pl.when(kv == qi)         # diagonal tile: apply the causal mask
    def _():
        process(masked=True)

    @pl.when(kv == pl.num_programs(2) - 1)
    def _():
        # normalize (EUP reciprocal), re-assemble heads into a (tq, C) slab, project, residual
        inv_l = pl.reciprocal(l_ref[...], approx=True)                 # (n_head, tq, 1)
        for h in range(n_head):
            y_ref[:, h * hd:(h + 1) * hd] = acc_ref[h] * inv_l[h]
        out = x_ref[0].astype(jnp.float32) + jnp.dot(
            y_ref[...].astype(jnp.bfloat16), wp_ref[...],
            preferred_element_type=jnp.float32) + bp_ref[...]          # resid_drop: identity
        o_ref[0] = out.astype(o_ref.dtype)


def _attn_half(x, q, k, v, p, *, tile, single_buffer, vmem_limit):
    B, T, C = x.shape
    n_head, hd = q.shape[1], q.shape[3]
    n_q = T // tile
    n_kv = T // tile

    def const_spec(arr, idx):
        if single_buffer:
            return pl.BlockSpec(arr.shape, idx, pipeline_mode=pl.Buffered(1))
        return pl.BlockSpec(arr.shape, idx)

    cidx = lambda b, i, s: (0, 0)
    kv_spec = pl.BlockSpec((1, n_head, tile, hd),
                           lambda b, i, s: (b, 0, jnp.minimum(s, i), 0))

    return pl.pallas_call(
        attn_kernel,
        out_shape=jax.ShapeDtypeStruct((B, T, C), x.dtype),
        grid=(B, n_q, n_kv),
        in_specs=[pl.BlockSpec((1, tile, C), lambda b, i, s: (b, i, 0)),          # residual x
                  pl.BlockSpec((1, n_head, tile, hd), lambda b, i, s: (b, 0, i, 0)),  # q
                  kv_spec,                                                         # k
                  kv_spec,                                                         # v
                  const_spec(p["wp"], cidx), const_spec(p["bp"], cidx)],
        out_specs=pl.BlockSpec((1, tile, C), lambda b, i, s: (b, i, 0)),
        scratch_shapes=[
            pltpu.VMEM((n_head, tile, hd), jnp.float32),   # acc (per head)
            pltpu.VMEM((n_head, tile, 1), jnp.float32),    # running max
            pltpu.VMEM((n_head, tile, 1), jnp.float32),    # running sum
            pltpu.VMEM((tile, C), jnp.float32),            # head re-assembly slab
        ],
        compiler_params=pltpu.CompilerParams(
            dimension_semantics=("parallel", "parallel", "arbitrary"),
            vmem_limit_bytes=vmem_limit),
    )(x, q, k, v, p["wp"], p["bp"])


# ------------------------------ 3) MLP kernel ------------------------------
# grid = (B, n_token_tiles, n_ff_tiles): the 4C dimension is K/N-tiled (axis "arbitrary");
# LN2(x) is cached in bf16 scratch, the residual + final bias seeds the f32 accumulator.

def mlp_kernel(x_ref, g2_ref, be2_ref, w1_ref, b1_ref, w2_ref, b2_ref, o_ref,
               acc_ref, h_ref):
    f = pl.program_id(2)

    @pl.when(f == 0)
    def _():
        x = x_ref[0].astype(jnp.float32)                    # (tile, C)
        h = _layernorm(x, g2_ref[...], be2_ref[...])
        h_ref[...] = h.astype(jnp.bfloat16)
        acc_ref[...] = x + b2_ref[...]                      # residual + final bias

    m = jnp.dot(h_ref[...], w1_ref[...],
                preferred_element_type=jnp.float32) + b1_ref[...]
    m = _gelu_exact(m)
    acc_ref[...] += jnp.dot(m.astype(jnp.bfloat16), w2_ref[...],
                            preferred_element_type=jnp.float32)

    @pl.when(f == pl.num_programs(2) - 1)
    def _():
        o_ref[0] = acc_ref[...].astype(o_ref.dtype)         # mlp dropout: identity (eval)


def _mlp_half(x, p, *, tile, ff_tile, single_buffer, vmem_limit):
    B, T, C = x.shape
    ff = p["w1"].shape[1]
    n_t = T // tile
    n_f = ff // ff_tile

    def const_spec(arr, idx):
        if single_buffer:
            return pl.BlockSpec(arr.shape, idx, pipeline_mode=pl.Buffered(1))
        return pl.BlockSpec(arr.shape, idx)

    cidx = lambda b, i, f: (0, 0)

    return pl.pallas_call(
        mlp_kernel,
        out_shape=jax.ShapeDtypeStruct((B, T, C), x.dtype),
        grid=(B, n_t, n_f),
        in_specs=[pl.BlockSpec((1, tile, C), lambda b, i, f: (b, i, 0)),
                  const_spec(p["ln2_g"], cidx), const_spec(p["ln2_b"], cidx),
                  pl.BlockSpec((C, ff_tile), lambda b, i, f: (0, f)),
                  pl.BlockSpec((1, ff_tile), lambda b, i, f: (0, f)),
                  pl.BlockSpec((ff_tile, C), lambda b, i, f: (f, 0)),
                  const_spec(p["b2"], cidx)],
        out_specs=pl.BlockSpec((1, tile, C), lambda b, i, f: (b, i, 0)),
        scratch_shapes=[pltpu.VMEM((tile, C), jnp.float32),     # accumulator
                        pltpu.VMEM((tile, C), jnp.bfloat16)],   # cached LN2 activation
        compiler_params=pltpu.CompilerParams(
            dimension_semantics=("parallel", "parallel", "arbitrary"),
            vmem_limit_bytes=vmem_limit),
    )(x, p["ln2_g"], p["ln2_b"], p["w1"], p["b1"], p["w2"], p["b2"])


# --------------------------------- wrapper ----------------------------------

def prepare_block_params(params, n_head):
    """One-time parameter prep: casts, fused QKV concat, 1/sqrt(hd) folded into Q weights."""
    C = params["wq"].shape[0]
    hd = C // n_head
    scale = 1.0 / math.sqrt(hd)
    f32, bf16 = jnp.float32, jnp.bfloat16
    wqkv = jnp.concatenate([params["wq"] * scale, params["wk"], params["wv"]], axis=1)
    bqkv = jnp.concatenate([params["bq"] * scale, params["bk"], params["bv"]], axis=1)
    return {
        "ln1_g": params["ln1_g"].astype(f32), "ln1_b": params["ln1_b"].astype(f32),
        "wqkv": wqkv.astype(bf16), "bqkv": bqkv.astype(f32),
        "wp": params["wp"].astype(bf16), "bp": params["bp"].astype(f32),
        "ln2_g": params["ln2_g"].astype(f32), "ln2_b": params["ln2_b"].astype(f32),
        "w1": params["w1"].astype(bf16), "b1": params["b1"].astype(f32),
        "w2": params["w2"].astype(bf16), "b2": params["b2"].astype(f32),
    }


def block_forward(x, prep, n_head, *, tile=None, ff_tile=None):
    """Eval-mode forward of Block (token_mixer='attn').  x: (B, T, C) float32."""
    B, T, C = x.shape
    assert C % n_head == 0
    if tile is None:
        tile = _pick_tile(T, 256, 8)     # 256 fills the v6e/v7x MXU; use 128 on v5e if desired
    assert T % tile == 0, "sequence length must be divisible by the token tile"
    ff = prep["w1"].shape[1]
    if ff_tile is None:
        ff_tile = _pick_tile(ff, 2048, 128)
    assert ff % ff_tile == 0

    vmem_limit = _vmem_limit_bytes()

    def run(single_buffer):
        q, k, v = _qkv_proj(x, prep, n_head, tile=tile,
                            single_buffer=single_buffer, vmem_limit=vmem_limit)
        y = _attn_half(x, q, k, v, prep, tile=tile,
                       single_buffer=single_buffer, vmem_limit=vmem_limit)
        return _mlp_half(y, prep, tile=tile, ff_tile=ff_tile,
                         single_buffer=single_buffer, vmem_limit=vmem_limit)

    try:
        return run(True)        # single-buffer constant-index weights (pl.Buffered(1))
    except Exception:
        return run(False)       # fallback: default double-buffered weights


# -------------------------- pure-JAX reference -------------------------------

def block_reference(x, params, n_head):
    B, T, C = x.shape
    hd = C // n_head

    def ln(h, g, b):
        mu = h.mean(-1, keepdims=True)
        var = ((h - mu) ** 2).mean(-1, keepdims=True)
        return (h - mu) / jnp.sqrt(var + 1e-5) * g + b

    h = ln(x, params["ln1_g"], params["ln1_b"])
    q = h @ params["wq"] + params["bq"][0]
    k = h @ params["wk"] + params["bk"][0]
    v = h @ params["wv"] + params["bv"][0]
    q = q.reshape(B, T, n_head, hd).transpose(0, 2, 1, 3)
    k = k.reshape(B, T, n_head, hd).transpose(0, 2, 1, 3)
    v = v.reshape(B, T, n_head, hd).transpose(0, 2, 1, 3)
    att = (q @ jnp.swapaxes(k, -1, -2)) * (1.0 / math.sqrt(hd))
    mask = jnp.tril(jnp.ones((T, T), bool))
    att = jnp.where(mask, att, -jnp.inf)
    att = jax.nn.softmax(att, axis=-1)
    y = (att @ v).transpose(0, 2, 1, 3).reshape(B, T, C)
    y = y @ params["wp"] + params["bp"][0]
    x = x + y

    h2 = ln(x, params["ln2_g"], params["ln2_b"])
    m = h2 @ params["w1"] + params["b1"][0]
    m = 0.5 * m * (1.0 + jax.scipy.special.erf(m / math.sqrt(2.0)))
    m = m @ params["w2"] + params["b2"][0]
    return x + m


# ------------------------------- params -------------------------------------

def init_params(key, C):
    std = 0.02
    ks = jax.random.split(key, 12)

    def lin_w(k, din, dout):
        return jax.random.normal(k, (din, dout), jnp.float32) * std

    def lin_b(k, dout):
        return jax.random.normal(k, (1, dout), jnp.float32) * std

    return {
        "ln1_g": jnp.ones((1, C), jnp.float32),
        "ln1_b": jnp.zeros((1, C), jnp.float32),
        "wq": lin_w(ks[0], C, C), "bq": lin_b(ks[1], C),
        "wk": lin_w(ks[2], C, C), "bk": lin_b(ks[3], C),
        "wv": lin_w(ks[4], C, C), "bv": lin_b(ks[5], C),
        "wp": lin_w(ks[6], C, C), "bp": lin_b(ks[7], C),
        "ln2_g": jnp.ones((1, C), jnp.float32),
        "ln2_b": jnp.zeros((1, C), jnp.float32),
        "w1": lin_w(ks[8], C, 4 * C), "b1": lin_b(ks[9], 4 * C),
        "w2": lin_w(ks[10], 4 * C, C), "b2": lin_b(ks[11], C),
    }


if __name__ == "__main__":
    key = jax.random.PRNGKey(0)
    kx, kp, kx2 = jax.random.split(key, 3)

    B, T, C, n_head = 2, 8, 32, 4
    params = init_params(kp, C)
    prep = prepare_block_params(params, n_head)

    # case 1: single tile (tile == T) -> diagonal-only path
    x = jax.random.normal(kx, (B, T, C), jnp.float32)
    out = jax.block_until_ready(block_forward(x, prep, n_head))
    ref = block_reference(x, params, n_head)
    assert out.shape == (B, T, C)
    err = float(jnp.max(jnp.abs(out - ref)))
    assert err < 1e-2, f"kernel/reference mismatch (single tile): max abs err = {err}"

    # case 2: multiple tiles -> exercises flash kv grid axis, causal skip + diagonal mask
    T2 = 16
    x2 = jax.random.normal(kx2, (B, T2, C), jnp.float32)
    out2 = jax.block_until_ready(block_forward(x2, prep, n_head, tile=8))
    ref2 = block_reference(x2, params, n_head)
    err2 = float(jnp.max(jnp.abs(out2 - ref2)))
    assert err2 < 1e-2, f"kernel/reference mismatch (multi tile): max abs err = {err2}"

    print("KERNEL_OK")
</pallas_src>

<mosaic_0001>
module attributes {stable_mosaic.version = 11 : i64} {
  func.func @qkv_proj_kernel(%arg0: i32, %arg1: i32, %arg2: memref<1x8x32xf32, #tpu.memory_space<vmem>>, %arg3: memref<1x32xf32, #tpu.memory_space<vmem>>, %arg4: memref<1x32xf32, #tpu.memory_space<vmem>>, %arg5: memref<32x96xbf16, #tpu.memory_space<vmem>>, %arg6: memref<1x96xf32, #tpu.memory_space<vmem>>, %arg7: memref<1x4x8x8xbf16, #tpu.memory_space<vmem>>, %arg8: memref<1x4x8x8xbf16, #tpu.memory_space<vmem>>, %arg9: memref<1x4x8x8xbf16, #tpu.memory_space<vmem>>) attributes {dimension_semantics = [#tpu.dimension_semantics<parallel>, #tpu.dimension_semantics<parallel>], iteration_bounds = array<i64: 2, 1>, scalar_prefetch = 0 : i64, scratch_operands = 0 : i64, tpu.core_type = #tpu.core_type<tc>, window_params = [{transform_indices = @transform_0, window_bounds = array<i64: 1, 8, 32>}, {pipeline_mode = #tpu.pipeline_mode<synchronous>, transform_indices = @transform_1, window_bounds = array<i64: 1, 32>}, {pipeline_mode = #tpu.pipeline_mode<synchronous>, transform_indices = @transform_2, window_bounds = array<i64: 1, 32>}, {pipeline_mode = #tpu.pipeline_mode<synchronous>, transform_indices = @transform_3, window_bounds = array<i64: 32, 96>}, {pipeline_mode = #tpu.pipeline_mode<synchronous>, transform_indices = @transform_4, window_bounds = array<i64: 1, 96>}, {transform_indices = @transform_5, window_bounds = array<i64: 1, 4, 8, 8>}, {transform_indices = @transform_6, window_bounds = array<i64: 1, 4, 8, 8>}, {transform_indices = @transform_7, window_bounds = array<i64: 1, 4, 8, 8>}]} {
    %c0 = arith.constant 0 : index
    %c0_0 = arith.constant 0 : index
    %c0_1 = arith.constant 0 : index
    %0 = vector.load %arg2[%c0, %c0_0, %c0_1] : memref<1x8x32xf32, #tpu.memory_space<vmem>>, vector<1x8x32xf32>
    %1 = vector.shape_cast %0 : vector<1x8x32xf32> to vector<8x32xf32>
    %c0_2 = arith.constant 0 : index
    %c0_3 = arith.constant 0 : index
    %2 = vector.load %arg3[%c0_2, %c0_3] : memref<1x32xf32, #tpu.memory_space<vmem>>, vector<1x32xf32>
    %c0_4 = arith.constant 0 : index
    %c0_5 = arith.constant 0 : index
    %3 = vector.load %arg4[%c0_4, %c0_5] : memref<1x32xf32, #tpu.memory_space<vmem>>, vector<1x32xf32>
    %cst = arith.constant dense<0.000000e+00> : vector<8xf32>
    %4 = vector.multi_reduction <add>, %1, %cst [1] : vector<8x32xf32> to vector<8xf32>
    %5 = vector.shape_cast %4 : vector<8xf32> to vector<8x1xf32>
    %cst_6 = arith.constant 3.200000e+01 : f32
    %6 = vector.broadcast %cst_6 : f32 to vector<8x1xf32>
    %7 = arith.divf %5, %6 : vector<8x1xf32>
    %8 = vector.broadcast %7 : vector<8x1xf32> to vector<8x32xf32>
    %9 = arith.subf %1, %8 : vector<8x32xf32>
    %10 = arith.mulf %9, %9 : vector<8x32xf32>
    %cst_7 = arith.constant dense<0.000000e+00> : vector<8xf32>
    %11 = vector.multi_reduction <add>, %10, %cst_7 [1] : vector<8x32xf32> to vector<8xf32>
    %12 = vector.shape_cast %11 : vector<8xf32> to vector<8x1xf32>
    %cst_8 = arith.constant 3.200000e+01 : f32
    %13 = vector.broadcast %cst_8 : f32 to vector<8x1xf32>
    %14 = arith.divf %12, %13 : vector<8x1xf32>
    %15 = vector.broadcast %7 : vector<8x1xf32> to vector<8x32xf32>
    %16 = arith.subf %1, %15 : vector<8x32xf32>
    %cst_9 = arith.constant 9.99999974E-6 : f32
    %17 = vector.broadcast %cst_9 : f32 to vector<8x1xf32>
    %18 = arith.addf %14, %17 : vector<8x1xf32>
    %19 = math.rsqrt %18 : vector<8x1xf32>
    %20 = vector.broadcast %19 : vector<8x1xf32> to vector<8x32xf32>
    %21 = arith.mulf %16, %20 : vector<8x32xf32>
    %22 = vector.broadcast %2 : vector<1x32xf32> to vector<8x32xf32>
    %23 = arith.mulf %21, %22 : vector<8x32xf32>
    %24 = vector.broadcast %3 : vector<1x32xf32> to vector<8x32xf32>
    %25 = arith.addf %23, %24 : vector<8x32xf32>
    %26 = arith.truncf %25 : vector<8x32xf32> to vector<8x32xbf16>
    %c0_10 = arith.constant 0 : index
    %c0_11 = arith.constant 0 : index
    %27 = vector.load %arg5[%c0_10, %c0_11] : memref<32x96xbf16, #tpu.memory_space<vmem>>, vector<32x96xbf16>
    %cst_12 = arith.constant dense<0.000000e+00> : vector<8x96xf32>
    %28 = tpu.matmul %26, %27, %cst_12 {dimension_numbers = #tpu.dot_dimension_numbers<[1], [0], [0], [1], [0, 0, 1, 1], [], []>} : vector<8x32xbf16>, vector<32x96xbf16>, vector<8x96xf32> -> vector<8x96xf32>
    %c0_13 = arith.constant 0 : index
    %c0_14 = arith.constant 0 : index
    %29 = vector.load %arg6[%c0_13, %c0_14] : memref<1x96xf32, #tpu.memory_space<vmem>>, vector<1x96xf32>
    %30 = vector.broadcast %29 : vector<1x96xf32> to vector<8x96xf32>
    %31 = arith.addf %28, %30 : vector<8x96xf32>
    %32 = vector.extract_strided_slice %31 {offsets = [0, 0], sizes = [8, 8], strides = [1, 1]} : vector<8x96xf32> to vector<8x8xf32>
    %33 = arith.truncf %32 : vector<8x8xf32> to vector<8x8xbf16>
    %c0_15 = arith.constant 0 : index
    %c0_16 = arith.constant 0 : index
    %c0_17 = arith.constant 0 : index
    %c0_18 = arith.constant 0 : index
    %34 = vector.load %arg7[%c0_15, %c0_16, %c0_17, %c0_18] : memref<1x4x8x8xbf16, #tpu.memory_space<vmem>>, vector<1x1x8x8xbf16>
    %35 = vector.shape_cast %34 : vector<1x1x8x8xbf16> to vector<8x8xbf16>
    %36 = vector.shape_cast %33 : vector<8x8xbf16> to vector<1x1x8x8xbf16>
    tpu.vector_store %arg7[%c0_15, %c0_16, %c0_17, %c0_18], %36 {strides = array<i32>} : memref<1x4x8x8xbf16, #tpu.memory_space<vmem>>, vector<1x1x8x8xbf16>,
    %37 = vector.extract_strided_slice %31 {offsets = [0, 32], sizes = [8, 8], strides = [1, 1]} : vector<8x96xf32> to vector<8x8xf32>
    %38 = arith.truncf %37 : vector<8x8xf32> to vector<8x8xbf16>
    %c0_19 = arith.constant 0 : index
    %c0_20 = arith.constant 0 : index
    %c0_21 = arith.constant 0 : index
    %c0_22 = arith.constant 0 : index
    %39 = vector.load %arg8[%c0_19, %c0_20, %c0_21, %c0_22] : memref<1x4x8x8xbf16, #tpu.memory_space<vmem>>, vector<1x1x8x8xbf16>
    %40 = vector.shape_cast %39 : vector<1x1x8x8xbf16> to vector<8x8xbf16>
    %41 = vector.shape_cast %38 : vector<8x8xbf16> to vector<1x1x8x8xbf16>
    tpu.vector_store %arg8[%c0_19, %c0_20, %c0_21, %c0_22], %41 {strides = array<i32>} : memref<1x4x8x8xbf16, #tpu.memory_space<vmem>>, vector<1x1x8x8xbf16>,
    %42 = vector.extract_strided_slice %31 {offsets = [0, 64], sizes = [8, 8], strides = [1, 1]} : vector<8x96xf32> to vector<8x8xf32>
    %43 = arith.truncf %42 : vector<8x8xf32> to vector<8x8xbf16>
    %c0_23 = arith.constant 0 : index
    %c0_24 = arith.constant 0 : index
    %c0_25 = arith.constant 0 : index
    %c0_26 = arith.constant 0 : index
    %44 = vector.load %arg9[%c0_23, %c0_24, %c0_25, %c0_26] : memref<1x4x8x8xbf16, #tpu.memory_space<vmem>>, vector<1x1x8x8xbf16>
    %45 = vector.shape_cast %44 : vector<1x1x8x8xbf16> to vector<8x8xbf16>
    %46 = vector.shape_cast %43 : vector<8x8xbf16> to vector<1x1x8x8xbf16>
    tpu.vector_store %arg9[%c0_23, %c0_24, %c0_25, %c0_26], %46 {strides = array<i32>} : memref<1x4x8x8xbf16, #tpu.memory_space<vmem>>, vector<1x1x8x8xbf16>,
    %47 = vector.extract_strided_slice %31 {offsets = [0, 8], sizes = [8, 8], strides = [1, 1]} : vector<8x96xf32> to vector<8x8xf32>
    %48 = arith.truncf %47 : vector<8x8xf32> to vector<8x8xbf16>
    %c0_27 = arith.constant 0 : index
    %c1 = arith.constant 1 : index
    %c0_28 = arith.constant 0 : index
    %c0_29 = arith.constant 0 : index
    %49 = vector.load %arg7[%c0_27, %c1, %c0_28, %c0_29] : memref<1x4x8x8xbf16, #tpu.memory_space<vmem>>, vector<1x1x8x8xbf16>
    %50 = vector.shape_cast %49 : vector<1x1x8x8xbf16> to vector<8x8xbf16>
    %51 = vector.shape_cast %48 : vector<8x8xbf16> to vector<1x1x8x8xbf16>
    tpu.vector_store %arg7[%c0_27, %c1, %c0_28, %c0_29], %51 {strides = array<i32>} : memref<1x4x8x8xbf16, #tpu.memory_space<vmem>>, vector<1x1x8x8xbf16>,
    %52 = vector.extract_strided_slice %31 {offsets = [0, 40], sizes = [8, 8], strides = [1, 1]} : vector<8x96xf32> to vector<8x8xf32>
    %53 = arith.truncf %52 : vector<8x8xf32> to vector<8x8xbf16>
    %c0_30 = arith.constant 0 : index
    %c1_31 = arith.constant 1 : index
    %c0_32 = arith.constant 0 : index
    %c0_33 = arith.constant 0 : index
    %54 = vector.load %arg8[%c0_30, %c1_31, %c0_32, %c0_33] : memref<1x4x8x8xbf16, #tpu.memory_space<vmem>>, vector<1x1x8x8xbf16>
    %55 = vector.shape_cast %54 : vector<1x1x8x8xbf16> to vector<8x8xbf16>
    %56 = vector.shape_cast %53 : vector<8x8xbf16> to vector<1x1x8x8xbf16>
    tpu.vector_store %arg8[%c0_30, %c1_31, %c0_32, %c0_33], %56 {strides = array<i32>} : memref<1x4x8x8xbf16, #tpu.memory_space<vmem>>, vector<1x1x8x8xbf16>,
    %57 = vector.extract_strided_slice %31 {offsets = [0, 72], sizes = [8, 8], strides = [1, 1]} : vector<8x96xf32> to vector<8x8xf32>
    %58 = arith.truncf %57 : vector<8x8xf32> to vector<8x8xbf16>
    %c0_34 = arith.constant 0 : index
    %c1_35 = arith.constant 1 : index
    %c0_36 = arith.constant 0 : index
    %c0_37 = arith.constant 0 : index
    %59 = vector.load %arg9[%c0_34, %c1_35, %c0_36, %c0_37] : memref<1x4x8x8xbf16, #tpu.memory_space<vmem>>, vector<1x1x8x8xbf16>
    %60 = vector.shape_cast %59 : vector<1x1x8x8xbf16> to vector<8x8xbf16>
    %61 = vector.shape_cast %58 : vector<8x8xbf16> to vector<1x1x8x8xbf16>
    tpu.vector_store %arg9[%c0_34, %c1_35, %c0_36, %c0_37], %61 {strides = array<i32>} : memref<1x4x8x8xbf16, #tpu.memory_space<vmem>>, vector<1x1x8x8xbf16>,
    %62 = vector.extract_strided_slice %31 {offsets = [0, 16], sizes = [8, 8], strides = [1, 1]} : vector<8x96xf32> to vector<8x8xf32>
    %63 = arith.truncf %62 : vector<8x8xf32> to vector<8x8xbf16>
    %c0_38 = arith.constant 0 : index
    %c2 = arith.constant 2 : index
    %c0_39 = arith.constant 0 : index
    %c0_40 = arith.constant 0 : index
    %64 = vector.load %arg7[%c0_38, %c2, %c0_39, %c0_40] : memref<1x4x8x8xbf16, #tpu.memory_space<vmem>>, vector<1x1x8x8xbf16>
    %65 = vector.shape_cast %64 : vector<1x1x8x8xbf16> to vector<8x8xbf16>
    %66 = vector.shape_cast %63 : vector<8x8xbf16> to vector<1x1x8x8xbf16>
    tpu.vector_store %arg7[%c0_38, %c2, %c0_39, %c0_40], %66 {strides = array<i32>} : memref<1x4x8x8xbf16, #tpu.memory_space<vmem>>, vector<1x1x8x8xbf16>,
    %67 = vector.extract_strided_slice %31 {offsets = [0, 48], sizes = [8, 8], strides = [1, 1]} : vector<8x96xf32> to vector<8x8xf32>
    %68 = arith.truncf %67 : vector<8x8xf32> to vector<8x8xbf16>
    %c0_41 = arith.constant 0 : index
    %c2_42 = arith.constant 2 : index
    %c0_43 = arith.constant 0 : index
    %c0_44 = arith.constant 0 : index
    %69 = vector.load %arg8[%c0_41, %c2_42, %c0_43, %c0_44] : memref<1x4x8x8xbf16, #tpu.memory_space<vmem>>, vector<1x1x8x8xbf16>
    %70 = vector.shape_cast %69 : vector<1x1x8x8xbf16> to vector<8x8xbf16>
    %71 = vector.shape_cast %68 : vector<8x8xbf16> to vector<1x1x8x8xbf16>
    tpu.vector_store %arg8[%c0_41, %c2_42, %c0_43, %c0_44], %71 {strides = array<i32>} : memref<1x4x8x8xbf16, #tpu.memory_space<vmem>>, vector<1x1x8x8xbf16>,
    %72 = vector.extract_strided_slice %31 {offsets = [0, 80], sizes = [8, 8], strides = [1, 1]} : vector<8x96xf32> to vector<8x8xf32>
    %73 = arith.truncf %72 : vector<8x8xf32> to vector<8x8xbf16>
    %c0_45 = arith.constant 0 : index
    %c2_46 = arith.constant 2 : index
    %c0_47 = arith.constant 0 : index
    %c0_48 = arith.constant 0 : index
    %74 = vector.load %arg9[%c0_45, %c2_46, %c0_47, %c0_48] : memref<1x4x8x8xbf16, #tpu.memory_space<vmem>>, vector<1x1x8x8xbf16>
    %75 = vector.shape_cast %74 : vector<1x1x8x8xbf16> to vector<8x8xbf16>
    %76 = vector.shape_cast %73 : vector<8x8xbf16> to vector<1x1x8x8xbf16>
    tpu.vector_store %arg9[%c0_45, %c2_46, %c0_47, %c0_48], %76 {strides = array<i32>} : memref<1x4x8x8xbf16, #tpu.memory_space<vmem>>, vector<1x1x8x8xbf16>,
    %77 = vector.extract_strided_slice %31 {offsets = [0, 24], sizes = [8, 8], strides = [1, 1]} : vector<8x96xf32> to vector<8x8xf32>
    %78 = arith.truncf %77 : vector<8x8xf32> to vector<8x8xbf16>
    %c0_49 = arith.constant 0 : index
    %c3 = arith.constant 3 : index
    %c0_50 = arith.constant 0 : index
    %c0_51 = arith.constant 0 : index
    %79 = vector.load %arg7[%c0_49, %c3, %c0_50, %c0_51] : memref<1x4x8x8xbf16, #tpu.memory_space<vmem>>, vector<1x1x8x8xbf16>
    %80 = vector.shape_cast %79 : vector<1x1x8x8xbf16> to vector<8x8xbf16>
    %81 = vector.shape_cast %78 : vector<8x8xbf16> to vector<1x1x8x8xbf16>
    tpu.vector_store %arg7[%c0_49, %c3, %c0_50, %c0_51], %81 {strides = array<i32>} : memref<1x4x8x8xbf16, #tpu.memory_space<vmem>>, vector<1x1x8x8xbf16>,
    %82 = vector.extract_strided_slice %31 {offsets = [0, 56], sizes = [8, 8], strides = [1, 1]} : vector<8x96xf32> to vector<8x8xf32>
    %83 = arith.truncf %82 : vector<8x8xf32> to vector<8x8xbf16>
    %c0_52 = arith.constant 0 : index
    %c3_53 = arith.constant 3 : index
    %c0_54 = arith.constant 0 : index
    %c0_55 = arith.constant 0 : index
    %84 = vector.load %arg8[%c0_52, %c3_53, %c0_54, %c0_55] : memref<1x4x8x8xbf16, #tpu.memory_space<vmem>>, vector<1x1x8x8xbf16>
    %85 = vector.shape_cast %84 : vector<1x1x8x8xbf16> to vector<8x8xbf16>
    %86 = vector.shape_cast %83 : vector<8x8xbf16> to vector<1x1x8x8xbf16>
    tpu.vector_store %arg8[%c0_52, %c3_53, %c0_54, %c0_55], %86 {strides = array<i32>} : memref<1x4x8x8xbf16, #tpu.memory_space<vmem>>, vector<1x1x8x8xbf16>,
    %87 = vector.extract_strided_slice %31 {offsets = [0, 88], sizes = [8, 8], strides = [1, 1]} : vector<8x96xf32> to vector<8x8xf32>
    %88 = arith.truncf %87 : vector<8x8xf32> to vector<8x8xbf16>
    %c0_56 = arith.constant 0 : index
    %c3_57 = arith.constant 3 : index
    %c0_58 = arith.constant 0 : index
    %c0_59 = arith.constant 0 : index
    %89 = vector.load %arg9[%c0_56, %c3_57, %c0_58, %c0_59] : memref<1x4x8x8xbf16, #tpu.memory_space<vmem>>, vector<1x1x8x8xbf16>
    %90 = vector.shape_cast %89 : vector<1x1x8x8xbf16> to vector<8x8xbf16>
    %91 = vector.shape_cast %88 : vector<8x8xbf16> to vector<1x1x8x8xbf16>
    tpu.vector_store %arg9[%c0_56, %c3_57, %c0_58, %c0_59], %91 {strides = array<i32>} : memref<1x4x8x8xbf16, #tpu.memory_space<vmem>>, vector<1x1x8x8xbf16>,
    return
  }
  func.func @transform_0(%arg0: i32, %arg1: i32) -> (i32, i32, i32) {
    %c0_i32 = arith.constant 0 : i32
    %c0_i32_0 = arith.constant 0 : i32
    return %arg0, %arg1, %c0_i32 : i32, i32, i32
  }
  func.func @transform_1(%arg0: i32, %arg1: i32) -> (i32, i32) {
    %c0_i32 = arith.constant 0 : i32
    %c0_i32_0 = arith.constant 0 : i32
    %c0_i32_1 = arith.constant 0 : i32
    return %c0_i32, %c0_i32_0 : i32, i32
  }
  func.func @transform_2(%arg0: i32, %arg1: i32) -> (i32, i32) {
    %c0_i32 = arith.constant 0 : i32
    %c0_i32_0 = arith.constant 0 : i32
    %c0_i32_1 = arith.constant 0 : i32
    return %c0_i32, %c0_i32_0 : i32, i32
  }
  func.func @transform_3(%arg0: i32, %arg1: i32) -> (i32, i32) {
    %c0_i32 = arith.constant 0 : i32
    %c0_i32_0 = arith.constant 0 : i32
    %c0_i32_1 = arith.constant 0 : i32
    return %c0_i32, %c0_i32_0 : i32, i32
  }
  func.func @transform_4(%arg0: i32, %arg1: i32) -> (i32, i32) {
    %c0_i32 = arith.constant 0 : i32
    %c0_i32_0 = arith.constant 0 : i32
    %c0_i32_1 = arith.constant 0 : i32
    return %c0_i32, %c0_i32_0 : i32, i32
  }
  func.func @transform_5(%arg0: i32, %arg1: i32) -> (i32, i32, i32, i32) {
    %c0_i32 = arith.constant 0 : i32
    %c0_i32_0 = arith.constant 0 : i32
    %c0_i32_1 = arith.constant 0 : i32
    return %arg0, %c0_i32, %arg1, %c0_i32_0 : i32, i32, i32, i32
  }
  func.func @transform_6(%arg0: i32, %arg1: i32) -> (i32, i32, i32, i32) {
    %c0_i32 = arith.constant 0 : i32
    %c0_i32_0 = arith.constant 0 : i32
    %c0_i32_1 = arith.constant 0 : i32
    return %arg0, %c0_i32, %arg1, %c0_i32_0 : i32, i32, i32, i32
  }
  func.func @transform_7(%arg0: i32, %arg1: i32) -> (i32, i32, i32, i32) {
    %c0_i32 = arith.constant 0 : i32
    %c0_i32_0 = arith.constant 0 : i32
    %c0_i32_1 = arith.constant 0 : i32
    return %arg0, %c0_i32, %arg1, %c0_i32_0 : i32, i32, i32, i32
  }
}

module attributes {stable_mosaic.version = 11 : i64} {
  func.func @qkv_proj_kernel(%arg0: i32, %arg1: i32, %arg2: memref<1x8x32xf32, #tpu.memory_space<vmem>>, %arg3: memref<1x32xf32, #tpu.memory_space<vmem>>, %arg4: memref<1x32xf32, #tpu.memory_space<vmem>>, %arg5: memref<32x96xbf16, #tpu.memory_space<vmem>>, %arg6: memref<1x96xf32, #tpu.memory_space<vmem>>, %arg7: memref<1x4x8x8xbf16, #tpu.memory_space<vmem>>, %arg8: memref<1x4x8x8xbf16, #tpu.memory_space<vmem>>, %arg9: memref<1x4x8x8xbf16, #tpu.memory_space<vmem>>) attributes {dimension_semantics = [#tpu.dimension_semantics<parallel>, #tpu.dimension_semantics<parallel>], iteration_bounds = array<i64: 2, 1>, scalar_prefetch = 0 : i64, scratch_operands = 0 : i64, tpu.core_type = #tpu.core_type<tc>, window_params = [{transform_indices = @transform_0, window_bounds = array<i64: 1, 8, 32>}, {pipeline_mode = #tpu.pipeline_mode<synchronous>, transform_indices = @transform_1, window_bounds = array<i64: 1, 32>}, {pipeline_mode = #tpu.pipeline_mode<synchronous>, transform_indices = @transform_2, window_bounds = array<i64: 1, 32>}, {pipeline_mode = #tpu.pipeline_mode<synchronous>, transform_indices = @transform_3, window_bounds = array<i64: 32, 96>}, {pipeline_mode = #tpu.pipeline_mode<synchronous>, transform_indices = @transform_4, window_bounds = array<i64: 1, 96>}, {transform_indices = @transform_5, window_bounds = array<i64: 1, 4, 8, 8>}, {transform_indices = @transform_6, window_bounds = array<i64: 1, 4, 8, 8>}, {transform_indices = @transform_7, window_bounds = array<i64: 1, 4, 8, 8>}]} {
    %c0 = arith.constant 0 : index
    %c0_0 = arith.constant 0 : index
    %c0_1 = arith.constant 0 : index
    %0 = vector.load %arg2[%c0, %c0_0, %c0_1] : memref<1x8x32xf32, #tpu.memory_space<vmem>>, vector<1x8x32xf32>
    %1 = vector.shape_cast %0 : vector<1x8x32xf32> to vector<8x32xf32>
    %c0_2 = arith.constant 0 : index
    %c0_3 = arith.constant 0 : index
    %2 = vector.load %arg3[%c0_2, %c0_3] : memref<1x32xf32, #tpu.memory_space<vmem>>, vector<1x32xf32>
    %c0_4 = arith.constant 0 : index
    %c0_5 = arith.constant 0 : index
    %3 = vector.load %arg4[%c0_4, %c0_5] : memref<1x32xf32, #tpu.memory_space<vmem>>, vector<1x32xf32>
    %cst = arith.constant dense<0.000000e+00> : vector<8xf32>
    %4 = vector.multi_reduction <add>, %1, %cst [1] : vector<8x32xf32> to vector<8xf32>
    %5 = vector.shape_cast %4 : vector<8xf32> to vector<8x1xf32>
    %cst_6 = arith.constant 3.200000e+01 : f32
    %6 = vector.broadcast %cst_6 : f32 to vector<8x1xf32>
    %7 = arith.divf %5, %6 : vector<8x1xf32>
    %8 = vector.broadcast %7 : vector<8x1xf32> to vector<8x32xf32>
    %9 = arith.subf %1, %8 : vector<8x32xf32>
    %10 = arith.mulf %9, %9 : vector<8x32xf32>
    %cst_7 = arith.constant dense<0.000000e+00> : vector<8xf32>
    %11 = vector.multi_reduction <add>, %10, %cst_7 [1] : vector<8x32xf32> to vector<8xf32>
    %12 = vector.shape_cast %11 : vector<8xf32> to vector<8x1xf32>
    %cst_8 = arith.constant 3.200000e+01 : f32
    %13 = vector.broadcast %cst_8 : f32 to vector<8x1xf32>
    %14 = arith.divf %12, %13 : vector<8x1xf32>
    %15 = vector.broadcast %7 : vector<8x1xf32> to vector<8x32xf32>
    %16 = arith.subf %1, %15 : vector<8x32xf32>
    %cst_9 = arith.constant 9.99999974E-6 : f32
    %17 = vector.broadcast %cst_9 : f32 to vector<8x1xf32>
    %18 = arith.addf %14, %17 : vector<8x1xf32>
    %19 = math.rsqrt %18 : vector<8x1xf32>
    %20 = vector.broadcast %19 : vector<8x1xf32> to vector<8x32xf32>
    %21 = arith.mulf %16, %20 : vector<8x32xf32>
    %22 = vector.broadcast %2 : vector<1x32xf32> to vector<8x32xf32>
    %23 = arith.mulf %21, %22 : vector<8x32xf32>
    %24 = vector.broadcast %3 : vector<1x32xf32> to vector<8x32xf32>
    %25 = arith.addf %23, %24 : vector<8x32xf32>
    %26 = arith.truncf %25 : vector<8x32xf32> to vector<8x32xbf16>
    %c0_10 = arith.constant 0 : index
    %c0_11 = arith.constant 0 : index
    %27 = vector.load %arg5[%c0_10, %c0_11] : memref<32x96xbf16, #tpu.memory_space<vmem>>, vector<32x96xbf16>
    %cst_12 = arith.constant dense<0.000000e+00> : vector<8x96xf32>
    %28 = tpu.matmul %26, %27, %cst_12 {dimension_numbers = #tpu.dot_dimension_numbers<[1], [0], [0], [1], [0, 0, 1, 1], [], []>} : vector<8x32xbf16>, vector<32x96xbf16>, vector<8x96xf32> -> vector<8x96xf32>
    %c0_13 = arith.constant 0 : index
    %c0_14 = arith.constant 0 : index
    %29 = vector.load %arg6[%c0_13, %c0_14] : memref<1x96xf32, #tpu.memory_space<vmem>>, vector<1x96xf32>
    %30 = vector.broadcast %29 : vector<1x96xf32> to vector<8x96xf32>
    %31 = arith.addf %28, %30 : vector<8x96xf32>
    %32 = vector.extract_strided_slice %31 {offsets = [0, 0], sizes = [8, 8], strides = [1, 1]} : vector<8x96xf32> to vector<8x8xf32>
    %33 = arith.truncf %32 : vector<8x8xf32> to vector<8x8xbf16>
    %c0_15 = arith.constant 0 : index
    %c0_16 = arith.constant 0 : index
    %c0_17 = arith.constant 0 : index
    %c0_18 = arith.constant 0 : index
    %34 = vector.load %arg7[%c0_15, %c0_16, %c0_17, %c0_18] : memref<1x4x8x8xbf16, #tpu.memory_space<vmem>>, vector<1x1x8x8xbf16>
    %35 = vector.shape_cast %34 : vector<1x1x8x8xbf16> to vector<8x8xbf16>
    %36 = vector.shape_cast %33 : vector<8x8xbf16> to vector<1x1x8x8xbf16>
    tpu.vector_store %arg7[%c0_15, %c0_16, %c0_17, %c0_18], %36 {strides = array<i32>} : memref<1x4x8x8xbf16, #tpu.memory_space<vmem>>, vector<1x1x8x8xbf16>,
    %37 = vector.extract_strided_slice %31 {offsets = [0, 32], sizes = [8, 8], strides = [1, 1]} : vector<8x96xf32> to vector<8x8xf32>
    %38 = arith.truncf %37 : vector<8x8xf32> to vector<8x8xbf16>
    %c0_19 = arith.constant 0 : index
    %c0_20 = arith.constant 0 : index
    %c0_21 = arith.constant 0 : index
    %c0_22 = arith.constant 0 : index
    %39 = vector.load %arg8[%c0_19, %c0_20, %c0_21, %c0_22] : memref<1x4x8x8xbf16, #tpu.memory_space<vmem>>, vector<1x1x8x8xbf16>
    %40 = vector.shape_cast %39 : vector<1x1x8x8xbf16> to vector<8x8xbf16>
    %41 = vector.shape_cast %38 : vector<8x8xbf16> to vector<1x1x8x8xbf16>
    tpu.vector_store %arg8[%c0_19, %c0_20, %c0_21, %c0_22], %41 {strides = array<i32>} : memref<1x4x8x8xbf16, #tpu.memory_space<vmem>>, vector<1x1x8x8xbf16>,
    %42 = vector.extract_strided_slice %31 {offsets = [0, 64], sizes = [8, 8], strides = [1, 1]} : vector<8x96xf32> to vector<8x8xf32>
    %43 = arith.truncf %42 : vector<8x8xf32> to vector<8x8xbf16>
    %c0_23 = arith.constant 0 : index
    %c0_24 = arith.constant 0 : index
    %c0_25 = arith.constant 0 : index
    %c0_26 = arith.constant 0 : index
    %44 = vector.load %arg9[%c0_23, %c0_24, %c0_25, %c0_26] : memref<1x4x8x8xbf16, #tpu.memory_space<vmem>>, vector<1x1x8x8xbf16>
    %45 = vector.shape_cast %44 : vector<1x1x8x8xbf16> to vector<8x8xbf16>
    %46 = vector.shape_cast %43 : vector<8x8xbf16> to vector<1x1x8x8xbf16>
    tpu.vector_store %arg9[%c0_23, %c0_24, %c0_25, %c0_26], %46 {strides = array<i32>} : memref<1x4x8x8xbf16, #tpu.memory_space<vmem>>, vector<1x1x8x8xbf16>,
    %47 = vector.extract_strided_slice %31 {offsets = [0, 8], sizes = [8, 8], strides = [1, 1]} : vector<8x96xf32> to vector<8x8xf32>
    %48 = arith.truncf %47 : vector<8x8xf32> to vector<8x8xbf16>
    %c0_27 = arith.constant 0 : index
    %c1 = arith.constant 1 : index
    %c0_28 = arith.constant 0 : index
    %c0_29 = arith.constant 0 : index
    %49 = vector.load %arg7[%c0_27, %c1, %c0_28, %c0_29] : memref<1x4x8x8xbf16, #tpu.memory_space<vmem>>, vector<1x1x8x8xbf16>
    %50 = vector.shape_cast %49 : vector<1x1x8x8xbf16> to vector<8x8xbf16>
    %51 = vector.shape_cast %48 : vector<8x8xbf16> to vector<1x1x8x8xbf16>
    tpu.vector_store %arg7[%c0_27, %c1, %c0_28, %c0_29], %51 {strides = array<i32>} : memref<1x4x8x8xbf16, #tpu.memory_space<vmem>>, vector<1x1x8x8xbf16>,
    %52 = vector.extract_strided_slice %31 {offsets = [0, 40], sizes = [8, 8], strides = [1, 1]} : vector<8x96xf32> to vector<8x8xf32>
    %53 = arith.truncf %52 : vector<8x8xf32> to vector<8x8xbf16>
    %c0_30 = arith.constant 0 : index
    %c1_31 = arith.constant 1 : index
    %c0_32 = arith.constant 0 : index
    %c0_33 = arith.constant 0 : index
    %54 = vector.load %arg8[%c0_30, %c1_31, %c0_32, %c0_33] : memref<1x4x8x8xbf16, #tpu.memory_space<vmem>>, vector<1x1x8x8xbf16>
    %55 = vector.shape_cast %54 : vector<1x1x8x8xbf16> to vector<8x8xbf16>
    %56 = vector.shape_cast %53 : vector<8x8xbf16> to vector<1x1x8x8xbf16>
    tpu.vector_store %arg8[%c0_30, %c1_31, %c0_32, %c0_33], %56 {strides = array<i32>} : memref<1x4x8x8xbf16, #tpu.memory_space<vmem>>, vector<1x1x8x8xbf16>,
    %57 = vector.extract_strided_slice %31 {offsets = [0, 72], sizes = [8, 8], strides = [1, 1]} : vector<8x96xf32> to vector<8x8xf32>
    %58 = arith.truncf %57 : vector<8x8xf32> to vector<8x8xbf16>
    %c0_34 = arith.constant 0 : index
    %c1_35 = arith.constant 1 : index
    %c0_36 = arith.constant 0 : index
    %c0_37 = arith.constant 0 : index
    %59 = vector.load %arg9[%c0_34, %c1_35, %c0_36, %c0_37] : memref<1x4x8x8xbf16, #tpu.memory_space<vmem>>, vector<1x1x8x8xbf16>
    %60 = vector.shape_cast %59 : vector<1x1x8x8xbf16> to vector<8x8xbf16>
    %61 = vector.shape_cast %58 : vector<8x8xbf16> to vector<1x1x8x8xbf16>
    tpu.vector_store %arg9[%c0_34, %c1_35, %c0_36, %c0_37], %61 {strides = array<i32>} : memref<1x4x8x8xbf16, #tpu.memory_space<vmem>>, vector<1x1x8x8xbf16>,
    %62 = vector.extract_strided_slice %31 {offsets = [0, 16], sizes = [8, 8], strides = [1, 1]} : vector<8x96xf32> to vector<8x8xf32>
    %63 = arith.truncf %62 : vector<8x8xf32> to vector<8x8xbf16>
    %c0_38 = arith.constant 0 : index
    %c2 = arith.constant 2 : index
    %c0_39 = arith.constant 0 : index
    %c0_40 = arith.constant 0 : index
    %64 = vector.load %arg7[%c0_38, %c2, %c0_39, %c0_40] : memref<1x4x8x8xbf16, #tpu.memory_space<vmem>>, vector<1x1x8x8xbf16>
    %65 = vector.shape_cast %64 : vector<1x1x8x8xbf16> to vector<8x8xbf16>
    %66 = vector.shape_cast %63 : vector<8x8xbf16> to vector<1x1x8x8xbf16>
    tpu.vector_store %arg7[%c0_38, %c2, %c0_39, %c0_40], %66 {strides = array<i32>} : memref<1x4x8x8xbf16, #tpu.memory_space<vmem>>, vector<1x1x8x8xbf16>,
    %67 = vector.extract_strided_slice %31 {offsets = [0, 48], sizes = [8, 8], strides = [1, 1]} : vector<8x96xf32> to vector<8x8xf32>
    %68 = arith.truncf %67 : vector<8x8xf32> to vector<8x8xbf16>
    %c0_41 = arith.constant 0 : index
    %c2_42 = arith.constant 2 : index
    %c0_43 = arith.constant 0 : index
    %c0_44 = arith.constant 0 : index
    %69 = vector.load %arg8[%c0_41, %c2_42, %c0_43, %c0_44] : memref<1x4x8x8xbf16, #tpu.memory_space<vmem>>, vector<1x1x8x8xbf16>
    %70 = vector.shape_cast %69 : vector<1x1x8x8xbf16> to vector<8x8xbf16>
    %71 = vector.shape_cast %68 : vector<8x8xbf16> to vector<1x1x8x8xbf16>
    tpu.vector_store %arg8[%c0_41, %c2_42, %c0_43, %c0_44], %71 {strides = array<i32>} : memref<1x4x8x8xbf16, #tpu.memory_space<vmem>>, vector<1x1x8x8xbf16>,
    %72 = vector.extract_strided_slice %31 {offsets = [0, 80], sizes = [8, 8], strides = [1, 1]} : vector<8x96xf32> to vector<8x8xf32>
    %73 = arith.truncf %72 : vector<8x8xf32> to vector<8x8xbf16>
    %c0_45 = arith.constant 0 : index
    %c2_46 = arith.constant 2 : index
    %c0_47 = arith.constant 0 : index
    %c0_48 = arith.constant 0 : index
    %74 = vector.load %arg9[%c0_45, %c2_46, %c0_47, %c0_48] : memref<1x4x8x8xbf16, #tpu.memory_space<vmem>>, vector<1x1x8x8xbf16>
    %75 = vector.shape_cast %74 : vector<1x1x8x8xbf16> to vector<8x8xbf16>
    %76 = vector.shape_cast %73 : vector<8x8xbf16> to vector<1x1x8x8xbf16>
    tpu.vector_store %arg9[%c0_45, %c2_46, %c0_47, %c0_48], %76 {strides = array<i32>} : memref<1x4x8x8xbf16, #tpu.memory_space<vmem>>, vector<1x1x8x8xbf16>,
    %77 = vector.extract_strided_slice %31 {offsets = [0, 24], sizes = [8, 8], strides = [1, 1]} : vector<8x96xf32> to vector<8x8xf32>
    %78 = arith.truncf %77 : vector<8x8xf32> to vector<8x8xbf16>
    %c0_49 = arith.constant 0 : index
    %c3 = arith.constant 3 : index
    %c0_50 = arith.constant 0 : index
    %c0_51 = arith.constant 0 : index
    %79 = vector.load %arg7[%c0_49, %c3, %c0_50, %c0_51] : memref<1x4x8x8xbf16, #tpu.memory_space<vmem>>, vector<1x1x8x8xbf16>
    %80 = vector.shape_cast %79 : vector<1x1x8x8xbf16> to vector<8x8xbf16>
    %81 = vector.shape_cast %78 : vector<8x8xbf16> to vector<1x1x8x8xbf16>
    tpu.vector_store %arg7[%c0_49, %c3, %c0_50, %c0_51], %81 {strides = array<i32>} : memref<1x4x8x8xbf16, #tpu.memory_space<vmem>>, vector<1x1x8x8xbf16>,
    %82 = vector.extract_strided_slice %31 {offsets = [0, 56], sizes = [8, 8], strides = [1, 1]} : vector<8x96xf32> to vector<8x8xf32>
    %83 = arith.truncf %82 : vector<8x8xf32> to vector<8x8xbf16>
    %c0_52 = arith.constant 0 : index
    %c3_53 = arith.constant 3 : index
    %c0_54 = arith.constant 0 : index
    %c0_55 = arith.constant 0 : index
    %84 = vector.load %arg8[%c0_52, %c3_53, %c0_54, %c0_55] : memref<1x4x8x8xbf16, #tpu.memory_space<vmem>>, vector<1x1x8x8xbf16>
    %85 = vector.shape_cast %84 : vector<1x1x8x8xbf16> to vector<8x8xbf16>
    %86 = vector.shape_cast %83 : vector<8x8xbf16> to vector<1x1x8x8xbf16>
    tpu.vector_store %arg8[%c0_52, %c3_53, %c0_54, %c0_55], %86 {strides = array<i32>} : memref<1x4x8x8xbf16, #tpu.memory_space<vmem>>, vector<1x1x8x8xbf16>,
    %87 = vector.extract_strided_slice %31 {offsets = [0, 88], sizes = [8, 8], strides = [1, 1]} : vector<8x96xf32> to vector<8x8xf32>
    %88 = arith.truncf %87 : vector<8x8xf32> to vector<8x8xbf16>
    %c0_56 = arith.constant 0 : index
    %c3_57 = arith.constant 3 : index
    %c0_58 = arith.constant 0 : index
    %c0_59 = arith.constant 0 : index
    %89 = vector.load %arg9[%c0_56, %c3_57, %c0_58, %c0_59] : memref<1x4x8x8xbf16, #tpu.memory_space<vmem>>, vector<1x1x8x8xbf16>
    %90 = vector.shape_cast %89 : vector<1x1x8x8xbf16> to vector<8x8xbf16>
    %91 = vector.shape_cast %88 : vector<8x8xbf16> to vector<1x1x8x8xbf16>
    tpu.vector_store %arg9[%c0_56, %c3_57, %c0_58, %c0_59], %91 {strides = array<i32>} : memref<1x4x8x8xbf16, #tpu.memory_space<vmem>>, vector<1x1x8x8xbf16>,
    return
  }
  func.func @transform_0(%arg0: i32, %arg1: i32) -> (i32, i32, i32) {
    %c0_i32 = arith.constant 0 : i32
    %c0_i32_0 = arith.constant 0 : i32
    return %arg0, %arg1, %c0_i32 : i32, i32, i32
  }
  func.func @transform_1(%arg0: i32, %arg1: i32) -> (i32, i32) {
    %c0_i32 = arith.constant 0 : i32
    %c0_i32_0 = arith.constant 0 : i32
    %c0_i32_1 = arith.constant 0 : i32
    return %c0_i32, %c0_i32_0 : i32, i32
  }
  func.func @transform_2(%arg0: i32, %arg1: i32) -> (i32, i32) {
    %c0_i32 = arith.constant 0 : i32
    %c0_i32_0 = arith.constant 0 : i32
    %c0_i32_1 = arith.constant 0 : i32
    return %c0_i32, %c0_i32_0 : i32, i32
  }
  func.func @transform_3(%arg0: i32, %arg1: i32) -> (i32, i32) {
    %c0_i32 = arith.constant 0 : i32
    %c0_i32_0 = arith.constant 0 : i32
    %c0_i32_1 = arith.constant 0 : i32
    return %c0_i32, %c0_i32_0 : i32, i32
  }
  func.func @transform_4(%arg0: i32, %arg1: i32) -> (i32, i32) {
    %c0_i32 = arith.constant 0 : i32
    %c0_i32_0 = arith.constant 0 : i32
    %c0_i32_1 = arith.constant 0 : i32
    return %c0_i32, %c0_i32_0 : i32, i32
  }
  func.func @transform_5(%arg0: i32, %arg1: i32) -> (i32, i32, i32, i32) {
    %c0_i32 = arith.constant 0 : i32
    %c0_i32_0 = arith.constant 0 : i32
    %c0_i32_1 = arith.constant 0 : i32
    return %arg0, %c0_i32, %arg1, %c0_i32_0 : i32, i32, i32, i32
  }
  func.func @transform_6(%arg0: i32, %arg1: i32) -> (i32, i32, i32, i32) {
    %c0_i32 = arith.constant 0 : i32
    %c0_i32_0 = arith.constant 0 : i32
    %c0_i32_1 = arith.constant 0 : i32
    return %arg0, %c0_i32, %arg1, %c0_i32_0 : i32, i32, i32, i32
  }
  func.func @transform_7(%arg0: i32, %arg1: i32) -> (i32, i32, i32, i32) {
    %c0_i32 = arith.constant 0 : i32
    %c0_i32_0 = arith.constant 0 : i32
    %c0_i32_1 = arith.constant 0 : i32
    return %arg0, %c0_i32, %arg1, %c0_i32_0 : i32, i32, i32, i32
  }
}

</mosaic_0001>

<bundles_post_ra>
// kernel: tpu_custom_call.1
= control target key start
LH: loop header
LB: loop body
LE: loop exit
PB: predicated region body
PF: predicated region fallthrough
CT: control target
= control target key end

     0   :  { %s1486_s0 = inlined_call_operand.hbm [shape: f32[2,8,32], index: 0, kind: input, shape index: {}]   ;;  %s1487_s1 = inlined_call_operand.vmem [shape: f32[1,32], index: 1, kind: input, shape index: {}]   ;;  %s1488_s2 = inlined_call_operand.vmem [shape: f32[1,32], index: 2, kind: input, shape index: {}]   ;;  %s1489_s3 = inlined_call_operand.hbm [shape: bf16[32,96], index: 3, kind: input, shape index: {}]   ;;  %s1490_s4 = inlined_call_operand.vmem [shape: f32[1,96], index: 4, kind: input, shape index: {}]   ;;  %s1491_s5 = inlined_call_operand.hbm [shape: bf16[2,4,8,8], index: 5, kind: output, shape index: {0}]   ;;  %s1492_s6 = inlined_call_operand.hbm [shape: bf16[2,4,8,8], index: 6, kind: output, shape index: {1}]   ;;  %s1493_s7 = inlined_call_operand.hbm [shape: bf16[2,4,8,8], index: 7, kind: output, shape index: {2}]  }
   0x1   :  { %1499 = sst [smem:[#allocation16_spill]] %s1489_s3 }
   0x2   :  { %13 = vsyncpa [#allocation3], 0 }
   0x3   :  { %15 = vsyncpa [#allocation3 + $0x1], 0 }
   0x4   :  { %16 = vsyncpa [#allocation6], 0 }
   0x5   :  { %17 = vsyncpa [#allocation4], 0 }
   0x6   :  { %19 = vsyncpa [#allocation4 + $0x1], 0 }
   0x7   :  { %20 = vsyncpa [#allocation9], 0 }
   0x8   :  { %22 = vsyncpa [#allocation9 + $0x1], 0  ;;  %s1150_s24 = smov 0   ;;  %s1152_s25 = smov 0  }
   0x9   :  { %s1154_s26 = smov 0   ;;  %s1156_s27 = smov 0  }
   0xa   :  { %s1158_s28 = smov 0   ;;  %s1160_s29 = smov 0  }
   0xb LB: > { %s1181_s30 = sadd.s32 4294967295, %s1087_s29   ;;  %s1497_s8 = sadd.s32 4294967294, %s1087_s29   ;;  %s1087_s29 = sphi %s1160_s29, %s28_s29   ;;  %s1083_s28 = sphi %s1158_s28, %s1523_s28   ;;  %s1079_s27 = sphi %s1156_s27, %s1522_s27   ;;  %s1075_s26 = sphi %s1154_s26, %s1521_s26   ;;  %s1071_s25 = sphi %s1152_s25, %s1520_s25   ;;  %s1067_s24 = sphi %s1150_s24, %s1519_s24  }
   0xc   : > { %p62_p0 = scmp.ne.s32.totalorder %s1071_s25, %s1067_s24  ;;  %p1494_p1 = scmp.eq.s32.totalorder %s1181_s30, 0 }
   0xd   : > { %p178_p3 = scmp.eq.s32.totalorder %s1497_s8, 1  ;;  %p727_p5 = scmp.ge.s32.totalorder %s1087_s29, 1 }
   0xe   : > { %p1192_p4 = por %p1494_p1, %p62_p0  ;;  %p241_p7 = scmp.lt.s32.totalorder %s1087_s29, 3 }
   0xf   : > { %p1197_p6 = por %p178_p3, %p62_p0  ;;  %s1089_s12 = smov [#allocation5]  }
  0x10   : > { %s1500_s9 = scalar_select %p1192_p4, 1, 0 }
  0x11   : > { %s1501_s10 = scalar_select %p1197_p6, 1, 0 }
  0x12   : > { %p1202_p8 = pnand %p727_p5, %p241_p7  ;;  %s259_s13 = sshll.u32 %s1089_s12, 4  ;;  %s260_s13 = int_to_ptr.vmem [resolvable:$true] %s259_s13 }
  0x13   : > { %s40_s15 = sadd.s32 1, %s1083_s28  ;;  %s1504_s3 = sld [smem:[#allocation16_spill]] }
  0x14   : > { %s1502_s11 = scalar_select %p1202_p8, 1, 0 }
  0x15   : > { %p792_p9 = pneg %p1202_p8 }
  0x17   : > { %p1211_p11 = pnand %p792_p9, %p1494_p1 }
  0x19   : > { %s883_s18 = scalar_lea.hbm %s1504_s3, 256  ;;  %p885_p13 = pneg %p1211_p11 }
  0x1a   : > { %p884_p12 = scmp.ne.s32.totalorder %s1504_s3, %s883_s18  ;;  %p890_p5 = scmp.lt.u32.totalorder %s883_s18, %s1504_s3 }
  0x1c   : > { %p886_p0 = pnand %p885_p13, %p884_p12 }
  0x1e   : > { %p887_p3 = pneg %p886_p0 }
  0x20   : > { %p892_p7 = pnand %p890_p5, %p887_p3 }
  0x22   : > { %895 = shalt.err (!%p892_p7)
}
  0x23   : > { %s896_s23 = scalar_lea.vmem %s260_s13, 256  ;;  %p904_p2 = scmp.lt.s32.totalorder %s260_s13, %s260_s13 }
  0x24   : > { %p897_p9 = scmp.ne.s32.totalorder %s260_s13, %s896_s23  ;;  %p905_p6 = scmp.lt.s32.totalorder %s896_s23, %s896_s23 }
  0x26   : > { %p899_p10 = pnand %p897_p9, %p885_p13  ;;  %p906_p4 = por %p905_p6, %p904_p2 }
  0x28   : > { %p900_p1 = pneg %p899_p10 }
  0x2a   : > { %p907_p8 = pnand %p906_p4, %p900_p1 }
  0x2c   : > { %910 = shalt.err (!%p907_p8)
}
  0x2d   : > { %s1090_s12 = smov 64   ;;  %s1091_s16 = smov 4  }
  0x2e   : > { %795 = dma.hbm_to_vmem [thread:$0]  (!%p1211_p11), %s1504_s3, 256, %s260_s13, [#allocation6], %s1090_s12, %s1090_s12, %s1091_s16  }
  0x2f   : > { %p42_p1 = scmp.ge.s32.totalorder %s40_s15, 2  ;;  %s49_s19 = sadd.s32 1, %s1075_s26 }
  0x30   : > { %p56_p2 = scmp.ne.s32.totalorder %s1075_s26, %s1071_s25  ;;  %p57_p4 = scmp.eq.s32.totalorder %s1087_s29, 0 }
  0x31   : > { %s1525_s15 = smov (%p42_p1, %s40_s15), 0  ;;  %p1507_p8 = scmp.eq.s32.totalorder %s1181_s30, 1 }
  0x32   : > { %1505 = sst [smem:[#allocation15_spill]] %s1525_s15  ;;  %p1238_p6 = por %p57_p4, %p56_p2 }
  0x33   : > { %p1244_p10 = por %p1507_p8, %p56_p2  ;;  %s44_s14 = ssub.s32 %s1083_s28, %s1525_s15 }
  0x34   : > { %p811_p12 = scmp.lt.s32.totalorder %s1087_s29, 2  ;;  %p47_p11 = scmp.eq.s32.totalorder %s44_s14, 0 }
  0x35   : > { %s276_s13 = sand.u32 1, %s1075_s26   ;;  %s731_s12 = sshll.u32 %s1083_s28, 7 }
  0x36   : > { %s730_s22 = sshll.u32 %s276_s13, 3  ;;  %s1259_s18 = scalar_lea.hbm %s1486_s0, %s731_s12 }
  0x37   : > { %s1253_s23 = scalar_select %p47_p11, %s1075_s26, %s49_s19  }
  0x38   : > { %s280_s8 = scalar_lea.vmem [#allocation2], %s730_s22  ;;  %p1265_p13 = pnand %p811_p12, %p1238_p6 }
  0x39   : > { %s288_s3 = sshll.u32 %s280_s8, 4  ;;  %s277_s19 = scalar_lea.sflag [#allocation3], %s276_s13  ;;  %s1261_s3 = int_to_ptr.vmem [resolvable:$true] %s288_s3 }
  0x3a   : > { %s911_s15 = scalar_lea.hbm %s1259_s18, 128  ;;  %p913_p3 = pneg %p1265_p13 }
  0x3b   : > { %p912_p0 = scmp.ne.s32.totalorder %s1259_s18, %s911_s15  ;;  %s916_s12 = scalar_lea.hbm %s1486_s0, 256 }
  0x3c   : > { %p917_p9 = scmp.lt.u32.totalorder %s1259_s18, %s1486_s0  ;;  %p918_p1 = scmp.lt.u32.totalorder %s916_s12, %s911_s15 }
  0x3d   : > { %p914_p5 = pnand %p913_p3, %p912_p0  ;;  %p920_p4 = scmp.lt.u32.totalorder %s911_s15, %s1259_s18 }
  0x3e   : > { %p919_p2 = por %p918_p1, %p917_p9 }
  0x3f   : > { %p915_p7 = pneg %p914_p5 }
  0x40   : > { %p921_p6 = por %p920_p4, %p919_p2 }
  0x42   : > { %p922_p8 = pnand %p921_p6, %p915_p7 }
  0x44   : > { %925 = shalt.err (!%p922_p8)
}
  0x45   : > { %s926_s13 = scalar_lea.vmem %s1261_s3, 128  ;;  %s1092_s17 = smov [#allocation2]  }
  0x46   : > { %p927_p12 = scmp.ne.s32.totalorder %s1261_s3, %s926_s13  ;;  %s931_s22 = sshll.u32 %s1092_s17, 4  ;;  %s932_s22 = int_to_ptr.vmem [resolvable:$false] %s931_s22 }
  0x47   : > { %s933_s8 = scalar_lea.vmem %s932_s22, 256  ;;  %p934_p5 = scmp.lt.s32.totalorder %s1261_s3, %s932_s22 }
  0x48   : > { %p929_p11 = pnand %p927_p12, %p913_p3  ;;  %p935_p9 = scmp.lt.s32.totalorder %s933_s8, %s926_s13 }
  0x4a   : > { %p930_p0 = pneg %p929_p11  ;;  %p936_p1 = por %p935_p9, %p934_p5 }
  0x4c   : > { %p937_p2 = pnand %p936_p1, %p930_p0 }
  0x4e   : > { %940 = shalt.err (!%p937_p2)
}
  0x4f   : > { %799 = dma.hbm_to_vmem [thread:$0]  (!%p1265_p13), %s1259_s18, 128, %s1261_s3, %s277_s19  }
  0x50   : > { %p1510_p7 = scmp.ne.s32.totalorder %s1502_s11, 0 }
  0x51   : > { %s1297_s15 = sand.u32 (!%p1510_p7), 1, %s1071_s25   ;;  %p1511_p3 = scmp.ne.s32.totalorder (!%p1510_p7), %s1500_s9, 0 }
  0x52   : > { %297 = sbr.rel (%p1510_p7) target bundleno = 812 (0x32c), region = 40  ;;  %s733_s12 = sshll.u32 (!%p1510_p7), %s1297_s15, 3 }
  0x53   : > { %s300_s20 = scalar_lea.sflag (!%p1510_p7), [#allocation3], %s1297_s15  ;;  %s303_s16 = scalar_lea.vmem (!%p1510_p7), [#allocation2], %s733_s12 }
  0x59   : > { %1050 = dma.done.wait (%p1511_p3), %s300_s20, 128  }
  0x5a   : > { %1052 = vsyncadd (%p1511_p3), %s300_s20, 4294967168  ;;  %p1512_p4 = scmp.eq.s32.totalorder %s1181_s30, 0 }
  0x5c   : > { %1054 = dma.done.wait (%p1512_p4), [#allocation6], 256   ;;  %p1513_p13 = pmov %p1512_p4 }
  0x5d   : > { %vm352_vm0 = vcmask 261120   ;;  %v349_v0 = vld [vmem:[%s303_s16] sm:$0xff]  ;;  %v879_v7 = vld [vmem:[#allocation5] sm:$0xff]   ;;  %v1093_v8 = vmov 0.0   ;;  %vm1094_vm1 = vmmov 0   ;;  %v880_v9 = vld [vmem:[#allocation5 + $0x8] sm:$0xff]  }
  0x5e   : > { %1056 = vsyncadd (%p1513_p13), [#allocation6], 4294967040  ;;  %v353_v1 = vsel %vm352_vm0, %v349_v0, 0.0  ;;  %772 = vmatprep.subr.bf16.mxu0 %v1093_v8  ;;  %776 = vmatprep.mubr.msk.bf16.mxu0 %vm1094_vm1, %v1093_v8  ;;  %v738_v14 = vld [vmem:[%s1487_s1] ss:$0 sm:$0xff]  ;;  %s1322_s13 = sshll.u32 %s1297_s15, 4 }
  0x5f   : > { %354 = vadd.xlane.f32.xlu0 %v353_v1  ;;  %773 = vmatpush3.bf16.msra.mxu0 %v879_v7  ;;  %v739_v16 = vld [vmem:[%s1488_s2] ss:$0 sm:$0xff]  ;;  %vm449_vm2 = vcmask 60416   ;;  %s1095_s17 = smov 80   ;;  %s1096_s22 = smov 96  }
  0x60   : > { %774 = vmatprep.subr.bf16.mxu0 %v1093_v8  ;;  %v740_v20 = vld [vmem:[%s1490_s4] ss:$0 sm:$0xff]  ;;  %s1325_s8 = scalar_lea.vmem [#allocation7], %s1322_s13  ;;  %s1097_s12 = smov 104  }
  0x61   : > { %s1098_s20 = smov 88   ;;  %s1099_s16 = smov 72  }
  0x62   : > { %s1100_s3 = smov 64   ;;  %s1101_s9 = smov 120  }
  0x63   : > { %775 = vmatpush3.bf16.msra.mxu0 %v880_v9  ;;  %s1102_s11 = smov 56   ;;  %s1103_s18 = smov 112  }
  0x64   : > { %s1104_s14 = smov 48   ;;  %s1105_s19 = smov 40  }
  0xec   : > { %v355_v2 = vpop.xlane.xlu0 %354 }
  0xed   : > { %v357_v3 = vmul.f32 0.03125, %v355_v2 }
  0xef   : > { %v358_v4 = vsub.f32 %v349_v0, %v357_v3 }
  0xf1   : > { %v359_v5 = vmul.f32 %v358_v4, %v358_v4 }
  0xf3   : > { %v360_v6 = vsel %vm352_vm0, %v359_v5, 0.0 }
  0xf4   : > { %361 = vadd.xlane.f32.xlu0 %v360_v6 }
 0x181   : > { %v362_v10 = vpop.xlane.xlu0 %361 }
 0x182   : > { %v363_v11 = vmul.f32 0.03125, %v362_v10 }
 0x184   : > { %v364_v12 = vadd.f32 1e-05, %v363_v11 }
 0x186   : > { %881 = vrsqrt.f32 %v364_v12 }
 0x190   : > { %v882_v13 = vpop.eup %881 }
 0x191   : > { %v366_v15 = vmul.f32 %v882_v13, %v358_v4 }
 0x193   : > { %v373_v17 = vmul.f32 %v738_v14, %v366_v15 }
 0x195   : > { %v380_v18 = vadd.f32 %v739_v16, %v373_v17 }
 0x197   : > { %v381_v19 = vpack.c.bf16 %v380_v18, %v380_v18 }
 0x199   : > { %777 = vmatmul.mubr.msk.bf16.vlgmr.msra.gmra.mrb[0].mxu0 %vm352_vm0, %v381_v19 }
 0x26c   : > { %v442_v21 = vpop.f32.mrb[0].mxu0 }
 0x26d   : > { %v443_v22 = vadd.f32 %v740_v20, %v442_v21  ;;  %v778_v23 = vpop.f32.mrb[1].mxu0 }
 0x26e   : > { %v445_v24 = vpop.f32.mrb[2].mxu0 }
 0x26f   : > { %v448_v25 = vpack.c.bf16 %v443_v22, %v443_v22  ;;  %v779_v26 = vpop.f32.mrb[3].mxu0 }
 0x271   : > { %482 = vrot.lane.b32.xlu0 %v448_v25, %s1095_s17  ;;  %454 = vrot.lane.b32.xlu1 %v448_v25, %s1096_s22  ;;  %450 = vst.msk [vmem:[%s1325_s8] sm:$0xf] %vm449_vm2, %v448_v25  ;;  %s340_s17 = scalar_lea.vmem [#allocation8], %s1322_s13 }
 0x272   : > { %s549_s22 = sshll.u32 %s340_s17, 4  ;;  %s1340_s22 = int_to_ptr.vmem [resolvable:$true] %s549_s22 }
 0x275   : > { %492 = vrot.lane.b32.xlu0 %v448_v25, %s1097_s12  ;;  %467 = vrot.lane.b32.xlu1 %v448_v25, %s1098_s20  ;;  %s512_s12 = sand.u32 1, %s1181_s30   ;;  %s1335_s20 = sshll.u32 %s1079_s27, 8 }
 0x276   : > { %s1349_s27 = scalar_lea.sflag [#allocation9], %s512_s12  ;;  %s941_s30 = scalar_lea.vmem %s1340_s22, 256 }
 0x277   : > { %p942_p6 = scmp.ne.s32.totalorder %s1340_s22, %s941_s30 }
 0x279   : > { %497 = vrot.lane.b32.xlu1 %v448_v25, %s1099_s16  ;;  %p943_p8 = pnand %p942_p6, %p1244_p10 }
 0x27b   : > { %p944_p12 = pneg %p943_p8 }
 0x27d   : > { %458 = vrot.lane.b32.xlu1 %v448_v25, %s1100_s3 }
 0x281   : > { %462 = vrot.lane.b32.xlu1 %v448_v25, %s1101_s9 }
 0x285   : > { %472 = vrot.lane.b32.xlu1 %v448_v25, %s1102_s11  ;;  %s1346_s11 = scalar_lea.hbm %s1492_s6, %s1335_s20 }
 0x289   : > { %477 = vrot.lane.b32.xlu1 %v448_v25, %s1103_s18  ;;  %s1106_s18 = smov [#allocation8]  }
 0x28d   : > { %487 = vrot.lane.b32.xlu1 %v448_v25, %s1104_s14  ;;  %s945_s14 = sshll.u32 %s1106_s18, 4  ;;  %s946_s14 = int_to_ptr.vmem [resolvable:$false] %s945_s14 }
 0x28e   : > { %p948_p11 = scmp.lt.s32.totalorder %s1340_s22, %s946_s14 }
 0x291   : > { %502 = vrot.lane.b32.xlu1 %v448_v25, %s1105_s19  ;;  %s947_s19 = scalar_lea.vmem %s946_s14, 512 }
 0x292   : > { %p949_p0 = scmp.lt.s32.totalorder %s947_s19, %s941_s30 }
 0x294   : > { %p950_p5 = por %p949_p0, %p948_p11 }
 0x296   : > { %p951_p9 = pnand %p950_p5, %p944_p12 }
 0x2e3   : > { %v483_v27 = vpop.permute.xlu0 %482  ;;  %v455_v28 = vpop.permute.xlu1 %454 }
 0x2e4   : > { %749 = vst.msk [vmem:[%s340_s17 + $0x8] sm:$0xf] %vm449_vm2, %v483_v27  ;;  %457 = vst.msk [vmem:[%s340_s17] sm:$0xf] %vm449_vm2, %v455_v28 }
 0x2e7   : > { %v493_v29 = vpop.permute.xlu0 %492  ;;  %v468_v30 = vpop.permute.xlu1 %467 }
 0x2e8   : > { %751 = vst.msk [vmem:[%s1325_s8 + $0xc] sm:$0xf] %vm449_vm2, %v493_v29  ;;  %746 = vst.msk [vmem:[%s340_s17 + $0x4] sm:$0xf] %vm449_vm2, %v468_v30 }
 0x2eb   : > { %v498_v31 = vpop.permute.xlu1 %497 }
 0x2ec   : > { %752 = vst.msk [vmem:[%s340_s17 + $0xc] sm:$0xf] %vm449_vm2, %v498_v31 }
 0x2ed   : > { %954 = shalt.err (!%p951_p9)
}
 0x2ee   : > { %s955_s17 = scalar_lea.hbm %s1346_s11, 256  ;;  %s959_s9 = scalar_lea.hbm %s1492_s6, 512 }
 0x2ef   : > { %p956_p1 = scmp.ne.s32.totalorder %s1346_s11, %s955_s17  ;;  %p960_p3 = scmp.lt.u32.totalorder %s1346_s11, %s1492_s6 }
 0x2f0   : > { %p961_p4 = scmp.lt.u32.totalorder %s959_s9, %s955_s17  ;;  %p963_p6 = scmp.lt.u32.totalorder %s955_s17, %s1346_s11 }
 0x2f1   : > { %p957_p2 = pnand %p956_p1, %p1244_p10 }
 0x2f2   : > { %p962_p13 = por %p961_p4, %p960_p3 }
 0x2f3   : > { %p958_p7 = pneg %p957_p2 }
 0x2f4   : > { %p964_p8 = por %p963_p6, %p962_p13 }
 0x2f6   : > { %p965_p12 = pnand %p964_p8, %p958_p7 }
 0x2f8   : > { %968 = shalt.err (!%p965_p12)
}
 0x2f9   : > { %s1107_s30 = smov 4   ;;  %v459_v32 = vpop.permute.xlu1 %458  ;;  %s1377_s19 = scalar_lea.vmem [#allocation10], %s1322_s13 }
 0x2fa   : > { %787 = dma.vmem_to_hbm [thread:$0]  (%p1244_p10), %s1340_s22, 256, %s1346_s11, %s1349_s27, %s1100_s3, %s1100_s3, %s1107_s30  }
 0x2fb   : > { %461 = vst.msk [vmem:[%s1377_s19] sm:$0xf] %vm449_vm2, %v459_v32  ;;  %s532_s17 = sshll.u32 %s1325_s8, 4  ;;  %s1392_s13 = scalar_lea.hbm %s1491_s5, %s1335_s20  ;;  %s1386_s17 = int_to_ptr.vmem [resolvable:$true] %s532_s17 }
 0x2fc   : > { %s969_s11 = scalar_lea.vmem %s1386_s17, 256  ;;  %s1108_s9 = smov [#allocation7]  }
 0x2fd   : > { %v463_v33 = vpop.permute.xlu1 %462  ;;  %p970_p11 = scmp.ne.s32.totalorder %s1386_s17, %s969_s11  ;;  %s973_s18 = sshll.u32 %s1108_s9, 4  ;;  %s974_s18 = int_to_ptr.vmem [resolvable:$false] %s973_s18 }
 0x2fe   : > { %745 = vst.msk [vmem:[%s1325_s8 + $0x4] sm:$0xf] %vm449_vm2, %v463_v33  ;;  %s975_s14 = scalar_lea.vmem %s974_s18, 512  ;;  %p976_p9 = scmp.lt.s32.totalorder %s1386_s17, %s974_s18 }
 0x2ff   : > { %p971_p0 = pnand %p970_p11, %p1244_p10  ;;  %p977_p1 = scmp.lt.s32.totalorder %s975_s14, %s969_s11 }
 0x301   : > { %v473_v34 = vpop.permute.xlu1 %472  ;;  %p972_p5 = pneg %p971_p0  ;;  %p978_p2 = por %p977_p1, %p976_p9 }
 0x302   : > { %747 = vst.msk [vmem:[%s1377_s19 + $0x4] sm:$0xf] %vm449_vm2, %v473_v34 }
 0x303   : > { %p979_p7 = pnand %p978_p2, %p972_p5 }
 0x305   : > { %v478_v35 = vpop.permute.xlu1 %477 }
 0x306   : > { %748 = vst.msk [vmem:[%s1325_s8 + $0x8] sm:$0xf] %vm449_vm2, %v478_v35 }
 0x307   : > { %982 = shalt.err (!%p979_p7)
}
 0x308   : > { %s983_s8 = scalar_lea.hbm %s1392_s13, 256  ;;  %s987_s9 = scalar_lea.hbm %s1491_s5, 512 }
 0x309   : > { %p984_p3 = scmp.ne.s32.totalorder %s1392_s13, %s983_s8  ;;  %p988_p6 = scmp.lt.u32.totalorder %s1392_s13, %s1491_s5 }
 0x30a   : > { %p989_p8 = scmp.lt.u32.totalorder %s987_s9, %s983_s8  ;;  %p991_p11 = scmp.lt.u32.totalorder %s983_s8, %s1392_s13 }
 0x30b   : > { %p985_p4 = pnand %p984_p3, %p1244_p10 }
 0x30c   : > { %p990_p12 = por %p989_p8, %p988_p6 }
 0x30d   : > { %p986_p13 = pneg %p985_p4 }
 0x30e   : > { %p992_p0 = por %p991_p11, %p990_p12 }
 0x310   : > { %p993_p5 = pnand %p992_p0, %p986_p13 }
 0x312   : > { %996 = shalt.err (!%p993_p5)
}
 0x313   : > { %s1514_s11 = scalar_lea.sflag [#allocation4], %s1297_s15  ;;  %s566_s22 = sshll.u32 %s1377_s19, 4  ;;  %v488_v36 = vpop.permute.xlu1 %487  ;;  %s1426_s22 = int_to_ptr.vmem [resolvable:$true] %s566_s22 }
 0x314   : > { %786 = dma.vmem_to_hbm [thread:$0]  (%p1244_p10), %s1386_s17, 256, %s1392_s13, %s1514_s11, %s1100_s3, %s1100_s3, %s1107_s30  }
 0x315   : > { %750 = vst.msk [vmem:[%s1377_s19 + $0x8] sm:$0xf] %vm449_vm2, %v488_v36  ;;  %s1432_s15 = scalar_lea.hbm %s1493_s7, %s1335_s20  ;;  %s997_s12 = scalar_lea.vmem %s1426_s22, 256 }
 0x316   : > { %p998_p9 = scmp.ne.s32.totalorder %s1426_s22, %s997_s12  ;;  %s1109_s17 = smov [#allocation10]  }
 0x317   : > { %v503_v37 = vpop.permute.xlu1 %502  ;;  %s1001_s13 = sshll.u32 %s1109_s17, 4  ;;  %s1002_s13 = int_to_ptr.vmem [resolvable:$false] %s1001_s13 }
 0x318   : > { %753 = vst.msk [vmem:[%s1377_s19 + $0xc] sm:$0xf] %vm449_vm2, %v503_v37  ;;  %p999_p1 = pnand %p998_p9, %p1244_p10  ;;  %s1003_s16 = scalar_lea.vmem %s1002_s13, 512 }
 0x319   : > { %p1004_p7 = scmp.lt.s32.totalorder %s1426_s22, %s1002_s13  ;;  %p1005_p3 = scmp.lt.s32.totalorder %s1003_s16, %s997_s12 }
 0x31a   : > { %p1000_p2 = pneg %p999_p1 }
 0x31b   : > { %p1006_p4 = por %p1005_p3, %p1004_p7 }
 0x31d   : > { %p1007_p13 = pnand %p1006_p4, %p1000_p2 }
 0x31f   : > { %1010 = shalt.err (!%p1007_p13)
}
 0x320   : > { %s1011_s20 = scalar_lea.hbm %s1432_s15, 256  ;;  %s1015_s18 = scalar_lea.hbm %s1493_s7, 512 }
 0x321   : > { %p1012_p6 = scmp.ne.s32.totalorder %s1432_s15, %s1011_s20  ;;  %p1016_p11 = scmp.lt.u32.totalorder %s1432_s15, %s1493_s7 }
 0x322   : > { %p1017_p0 = scmp.lt.u32.totalorder %s1015_s18, %s1011_s20  ;;  %p1019_p9 = scmp.lt.u32.totalorder %s1011_s20, %s1432_s15 }
 0x323   : > { %p1013_p8 = pnand %p1012_p6, %p1244_p10 }
 0x324   : > { %p1018_p5 = por %p1017_p0, %p1016_p11 }
 0x325   : > { %p1014_p12 = pneg %p1013_p8 }
 0x326   : > { %p1020_p1 = por %p1019_p9, %p1018_p5 }
 0x328   : > { %p1021_p2 = pnand %p1020_p1, %p1014_p12 }
 0x32a   : > { %1024 = shalt.err (!%p1021_p2)
}
 0x32b   : > { %788 = dma.vmem_to_hbm [thread:$0]  (%p1244_p10), %s1426_s22, 256, %s1432_s15, %s1349_s27, %s1100_s3, %s1100_s3, %s1107_s30  }
 0x32c PF: > { %s581_s8 = sand.u32 1, %s1067_s24   ;;  %p1515_p7 = scmp.ne.s32.totalorder %s1501_s10, 0 }
 0x32d   : > { %p1516_p3 = scmp.ge.s32.totalorder %s1087_s29, 2  ;;  %s582_s12 = scalar_lea.sflag [#allocation4], %s581_s8 }
 0x32f   : > { %p801_p4 = pnand %p1516_p3, %p1515_p7 }
 0x331   : > { %1058 = dma.done.wait (!%p801_p4), %s582_s12, 256  }
 0x332   : > { %1060 = vsyncadd (!%p801_p4), %s582_s12, 4294967040  ;;  %s1517_s21 = sadd.s32 4294967294, %s1087_s29  }
 0x333   : > { %s590_s17 = sand.u32 1, %s1517_s21  }
 0x334   : > { %s591_s13 = scalar_lea.sflag [#allocation9], %s590_s17 }
 0x335   : > { %1062 = dma.done.wait (!%p801_p4), %s591_s13, 512  }
 0x336   : > { %1064 = vsyncadd (!%p801_p4), %s591_s13, 4294966784  ;;  %s28_s29 = sadd.s32 1, %s1087_s29   ;;  %s1518_s3 = sld [smem:[#allocation15_spill]] }
 0x337   : > { %p25_p10 = scmp.ge.s32.totalorder %s28_s29, 4   ;;  %s1519_s24 = smov %s1071_s25 }
 0x338   : > { %s1520_s25 = smov %s1075_s26  ;;  %s1521_s26 = smov %s1253_s23 }
 0x339   : > { %s1522_s27 = smov %s1083_s28  ;;  %27 = sbr.rel (!%p25_p10) target bundleno = 11 (0xb), region = 130 }
 0x33c   : > { %s1523_s28 = smov %s1518_s3 }
 0x340   :  { %605 = vsyncpa [#allocation3], 1 }
 0x341   :  { %607 = vsyncpa [#allocation3 + $0x1], 1 }
 0x342   :  { %608 = vsyncpa [#allocation6], 1 }
 0x343   :  { %609 = vsyncpa [#allocation4], 1 }
 0x344   :  { %611 = vsyncpa [#allocation4 + $0x1], 1 }
 0x345   :  { %612 = vsyncpa [#allocation9], 1 }
 0x346   :  { %614 = vsyncpa [#allocation9 + $0x1], 1 }

// kernel: tpu_custom_call.1
= control target key start
LH: loop header
LB: loop body
LE: loop exit
PB: predicated region body
PF: predicated region fallthrough
CT: control target
= control target key end

     0   :  { %s1486_s0 = inlined_call_operand.hbm [shape: f32[2,8,32], index: 0, kind: input, shape index: {}]   ;;  %s1487_s1 = inlined_call_operand.vmem [shape: f32[1,32], index: 1, kind: input, shape index: {}]   ;;  %s1488_s2 = inlined_call_operand.vmem [shape: f32[1,32], index: 2, kind: input, shape index: {}]   ;;  %s1489_s3 = inlined_call_operand.hbm [shape: bf16[32,96], index: 3, kind: input, shape index: {}]   ;;  %s1490_s4 = inlined_call_operand.vmem [shape: f32[1,96], index: 4, kind: input, shape index: {}]   ;;  %s1491_s5 = inlined_call_operand.hbm [shape: bf16[2,4,8,8], index: 5, kind: output, shape index: {0}]   ;;  %s1492_s6 = inlined_call_operand.hbm [shape: bf16[2,4,8,8], index: 6, kind: output, shape index: {1}]   ;;  %s1493_s7 = inlined_call_operand.hbm [shape: bf16[2,4,8,8], index: 7, kind: output, shape index: {2}]  }
   0x1   :  { %1499 = sst [smem:[#allocation16_spill]] %s1489_s3 }
   0x2   :  { %13 = vsyncpa [#allocation3], 0 }
   0x3   :  { %15 = vsyncpa [#allocation3 + $0x1], 0 }
   0x4   :  { %16 = vsyncpa [#allocation6], 0 }
   0x5   :  { %17 = vsyncpa [#allocation4], 0 }
   0x6   :  { %19 = vsyncpa [#allocation4 + $0x1], 0 }
   0x7   :  { %20 = vsyncpa [#allocation9], 0 }
   0x8   :  { %22 = vsyncpa [#allocation9 + $0x1], 0  ;;  %s1150_s24 = smov 0   ;;  %s1152_s25 = smov 0  }
   0x9   :  { %s1154_s26 = smov 0   ;;  %s1156_s27 = smov 0  }
   0xa   :  { %s1158_s28 = smov 0   ;;  %s1160_s29 = smov 0  }
   0xb LB: > { %s1181_s30 = sadd.s32 4294967295, %s1087_s29   ;;  %s1497_s8 = sadd.s32 4294967294, %s1087_s29   ;;  %s1087_s29 = sphi %s1160_s29, %s28_s29   ;;  %s1083_s28 = sphi %s1158_s28, %s1523_s28   ;;  %s1079_s27 = sphi %s1156_s27, %s1522_s27   ;;  %s1075_s26 = sphi %s1154_s26, %s1521_s26   ;;  %s1071_s25 = sphi %s1152_s25, %s1520_s25   ;;  %s1067_s24 = sphi %s1150_s24, %s1519_s24  }
   0xc   : > { %p62_p0 = scmp.ne.s32.totalorder %s1071_s25, %s1067_s24  ;;  %p1494_p1 = scmp.eq.s32.totalorder %s1181_s30, 0 }
   0xd   : > { %p178_p3 = scmp.eq.s32.totalorder %s1497_s8, 1  ;;  %p727_p5 = scmp.ge.s32.totalorder %s1087_s29, 1 }
   0xe   : > { %p1192_p4 = por %p1494_p1, %p62_p0  ;;  %p241_p7 = scmp.lt.s32.totalorder %s1087_s29, 3 }
   0xf   : > { %p1197_p6 = por %p178_p3, %p62_p0  ;;  %s1089_s12 = smov [#allocation5]  }
  0x10   : > { %s1500_s9 = scalar_select %p1192_p4, 1, 0 }
  0x11   : > { %s1501_s10 = scalar_select %p1197_p6, 1, 0 }
  0x12   : > { %p1202_p8 = pnand %p727_p5, %p241_p7  ;;  %s259_s13 = sshll.u32 %s1089_s12, 4  ;;  %s260_s13 = int_to_ptr.vmem [resolvable:$true] %s259_s13 }
  0x13   : > { %s40_s15 = sadd.s32 1, %s1083_s28  ;;  %s1504_s3 = sld [smem:[#allocation16_spill]] }
  0x14   : > { %s1502_s11 = scalar_select %p1202_p8, 1, 0 }
  0x15   : > { %p792_p9 = pneg %p1202_p8 }
  0x17   : > { %p1211_p11 = pnand %p792_p9, %p1494_p1 }
  0x19   : > { %s883_s18 = scalar_lea.hbm %s1504_s3, 256  ;;  %p885_p13 = pneg %p1211_p11 }
  0x1a   : > { %p884_p12 = scmp.ne.s32.totalorder %s1504_s3, %s883_s18  ;;  %p890_p5 = scmp.lt.u32.totalorder %s883_s18, %s1504_s3 }
  0x1c   : > { %p886_p0 = pnand %p885_p13, %p884_p12 }
  0x1e   : > { %p887_p3 = pneg %p886_p0 }
  0x20   : > { %p892_p7 = pnand %p890_p5, %p887_p3 }
  0x22   : > { %895 = shalt.err (!%p892_p7)
}
  0x23   : > { %s896_s23 = scalar_lea.vmem %s260_s13, 256  ;;  %p904_p2 = scmp.lt.s32.totalorder %s260_s13, %s260_s13 }
  0x24   : > { %p897_p9 = scmp.ne.s32.totalorder %s260_s13, %s896_s23  ;;  %p905_p6 = scmp.lt.s32.totalorder %s896_s23, %s896_s23 }
  0x26   : > { %p899_p10 = pnand %p897_p9, %p885_p13  ;;  %p906_p4 = por %p905_p6, %p904_p2 }
  0x28   : > { %p900_p1 = pneg %p899_p10 }
  0x2a   : > { %p907_p8 = pnand %p906_p4, %p900_p1 }
  0x2c   : > { %910 = shalt.err (!%p907_p8)
}
  0x2d   : > { %s1090_s12 = smov 64   ;;  %s1091_s16 = smov 4  }
  0x2e   : > { %795 = dma.hbm_to_vmem [thread:$0]  (!%p1211_p11), %s1504_s3, 256, %s260_s13, [#allocation6], %s1090_s12, %s1090_s12, %s1091_s16  }
  0x2f   : > { %p42_p1 = scmp.ge.s32.totalorder %s40_s15, 2  ;;  %s49_s19 = sadd.s32 1, %s1075_s26 }
  0x30   : > { %p56_p2 = scmp.ne.s32.totalorder %s1075_s26, %s1071_s25  ;;  %p57_p4 = scmp.eq.s32.totalorder %s1087_s29, 0 }
  0x31   : > { %s1525_s15 = smov (%p42_p1, %s40_s15), 0  ;;  %p1507_p8 = scmp.eq.s32.totalorder %s1181_s30, 1 }
  0x32   : > { %1505 = sst [smem:[#allocation15_spill]] %s1525_s15  ;;  %p1238_p6 = por %p57_p4, %p56_p2 }
  0x33   : > { %p1244_p10 = por %p1507_p8, %p56_p2  ;;  %s44_s14 = ssub.s32 %s1083_s28, %s1525_s15 }
  0x34   : > { %p811_p12 = scmp.lt.s32.totalorder %s1087_s29, 2  ;;  %p47_p11 = scmp.eq.s32.totalorder %s44_s14, 0 }
  0x35   : > { %s276_s13 = sand.u32 1, %s1075_s26   ;;  %s731_s12 = sshll.u32 %s1083_s28, 7 }
  0x36   : > { %s730_s22 = sshll.u32 %s276_s13, 3  ;;  %s1259_s18 = scalar_lea.hbm %s1486_s0, %s731_s12 }
  0x37   : > { %s1253_s23 = scalar_select %p47_p11, %s1075_s26, %s49_s19  }
  0x38   : > { %s280_s8 = scalar_lea.vmem [#allocation2], %s730_s22  ;;  %p1265_p13 = pnand %p811_p12, %p1238_p6 }
  0x39   : > { %s288_s3 = sshll.u32 %s280_s8, 4  ;;  %s277_s19 = scalar_lea.sflag [#allocation3], %s276_s13  ;;  %s1261_s3 = int_to_ptr.vmem [resolvable:$true] %s288_s3 }
  0x3a   : > { %s911_s15 = scalar_lea.hbm %s1259_s18, 128  ;;  %p913_p3 = pneg %p1265_p13 }
  0x3b   : > { %p912_p0 = scmp.ne.s32.totalorder %s1259_s18, %s911_s15  ;;  %s916_s12 = scalar_lea.hbm %s1486_s0, 256 }
  0x3c   : > { %p917_p9 = scmp.lt.u32.totalorder %s1259_s18, %s1486_s0  ;;  %p918_p1 = scmp.lt.u32.totalorder %s916_s12, %s911_s15 }
  0x3d   : > { %p914_p5 = pnand %p913_p3, %p912_p0  ;;  %p920_p4 = scmp.lt.u32.totalorder %s911_s15, %s1259_s18 }
  0x3e   : > { %p919_p2 = por %p918_p1, %p917_p9 }
  0x3f   : > { %p915_p7 = pneg %p914_p5 }
  0x40   : > { %p921_p6 = por %p920_p4, %p919_p2 }
  0x42   : > { %p922_p8 = pnand %p921_p6, %p915_p7 }
  0x44   : > { %925 = shalt.err (!%p922_p8)
}
  0x45   : > { %s926_s13 = scalar_lea.vmem %s1261_s3, 128  ;;  %s1092_s17 = smov [#allocation2]  }
  0x46   : > { %p927_p12 = scmp.ne.s32.totalorder %s1261_s3, %s926_s13  ;;  %s931_s22 = sshll.u32 %s1092_s17, 4  ;;  %s932_s22 = int_to_ptr.vmem [resolvable:$false] %s931_s22 }
  0x47   : > { %s933_s8 = scalar_lea.vmem %s932_s22, 256  ;;  %p934_p5 = scmp.lt.s32.totalorder %s1261_s3, %s932_s22 }
  0x48   : > { %p929_p11 = pnand %p927_p12, %p913_p3  ;;  %p935_p9 = scmp.lt.s32.totalorder %s933_s8, %s926_s13 }
  0x4a   : > { %p930_p0 = pneg %p929_p11  ;;  %p936_p1 = por %p935_p9, %p934_p5 }
  0x4c   : > { %p937_p2 = pnand %p936_p1, %p930_p0 }
  0x4e   : > { %940 = shalt.err (!%p937_p2)
}
  0x4f   : > { %799 = dma.hbm_to_vmem [thread:$0]  (!%p1265_p13), %s1259_s18, 128, %s1261_s3, %s277_s19  }
  0x50   : > { %p1510_p7 = scmp.ne.s32.totalorder %s1502_s11, 0 }
  0x51   : > { %s1297_s15 = sand.u32 (!%p1510_p7), 1, %s1071_s25   ;;  %p1511_p3 = scmp.ne.s32.totalorder (!%p1510_p7), %s1500_s9, 0 }
  0x52   : > { %297 = sbr.rel (%p1510_p7) target bundleno = 812 (0x32c), region = 40  ;;  %s733_s12 = sshll.u32 (!%p1510_p7), %s1297_s15, 3 }
  0x53   : > { %s300_s20 = scalar_lea.sflag (!%p1510_p7), [#allocation3], %s1297_s15  ;;  %s303_s16 = scalar_lea.vmem (!%p1510_p7), [#allocation2], %s733_s12 }
  0x59   : > { %1050 = dma.done.wait (%p1511_p3), %s300_s20, 128  }
  0x5a   : > { %1052 = vsyncadd (%p1511_p3), %s300_s20, 4294967168  ;;  %p1512_p4 = scmp.eq.s32.totalorder %s1181_s30, 0 }
  0x5c   : > { %1054 = dma.done.wait (%p1512_p4), [#allocation6], 256   ;;  %p1513_p13 = pmov %p1512_p4 }
  0x5d   : > { %vm352_vm0 = vcmask 261120   ;;  %v349_v0 = vld [vmem:[%s303_s16] sm:$0xff]  ;;  %v879_v7 = vld [vmem:[#allocation5] sm:$0xff]   ;;  %v1093_v8 = vmov 0.0   ;;  %vm1094_vm1 = vmmov 0   ;;  %v880_v9 = vld [vmem:[#allocation5 + $0x8] sm:$0xff]  }
  0x5e   : > { %1056 = vsyncadd (%p1513_p13), [#allocation6], 4294967040  ;;  %v353_v1 = vsel %vm352_vm0, %v349_v0, 0.0  ;;  %772 = vmatprep.subr.bf16.mxu0 %v1093_v8  ;;  %776 = vmatprep.mubr.msk.bf16.mxu0 %vm1094_vm1, %v1093_v8  ;;  %v738_v14 = vld [vmem:[%s1487_s1] ss:$0 sm:$0xff]  ;;  %s1322_s13 = sshll.u32 %s1297_s15, 4 }
  0x5f   : > { %354 = vadd.xlane.f32.xlu0 %v353_v1  ;;  %773 = vmatpush3.bf16.msra.mxu0 %v879_v7  ;;  %v739_v16 = vld [vmem:[%s1488_s2] ss:$0 sm:$0xff]  ;;  %vm449_vm2 = vcmask 60416   ;;  %s1095_s17 = smov 80   ;;  %s1096_s22 = smov 96  }
  0x60   : > { %774 = vmatprep.subr.bf16.mxu0 %v1093_v8  ;;  %v740_v20 = vld [vmem:[%s1490_s4] ss:$0 sm:$0xff]  ;;  %s1325_s8 = scalar_lea.vmem [#allocation7], %s1322_s13  ;;  %s1097_s12 = smov 104  }
  0x61   : > { %s1098_s20 = smov 88   ;;  %s1099_s16 = smov 72  }
  0x62   : > { %s1100_s3 = smov 64   ;;  %s1101_s9 = smov 120  }
  0x63   : > { %775 = vmatpush3.bf16.msra.mxu0 %v880_v9  ;;  %s1102_s11 = smov 56   ;;  %s1103_s18 = smov 112  }
  0x64   : > { %s1104_s14 = smov 48   ;;  %s1105_s19 = smov 40  }
  0xec   : > { %v355_v2 = vpop.xlane.xlu0 %354 }
  0xed   : > { %v357_v3 = vmul.f32 0.03125, %v355_v2 }
  0xef   : > { %v358_v4 = vsub.f32 %v349_v0, %v357_v3 }
  0xf1   : > { %v359_v5 = vmul.f32 %v358_v4, %v358_v4 }
  0xf3   : > { %v360_v6 = vsel %vm352_vm0, %v359_v5, 0.0 }
  0xf4   : > { %361 = vadd.xlane.f32.xlu0 %v360_v6 }
 0x181   : > { %v362_v10 = vpop.xlane.xlu0 %361 }
 0x182   : > { %v363_v11 = vmul.f32 0.03125, %v362_v10 }
 0x184   : > { %v364_v12 = vadd.f32 1e-05, %v363_v11 }
 0x186   : > { %881 = vrsqrt.f32 %v364_v12 }
 0x190   : > { %v882_v13 = vpop.eup %881 }
 0x191   : > { %v366_v15 = vmul.f32 %v882_v13, %v358_v4 }
 0x193   : > { %v373_v17 = vmul.f32 %v738_v14, %v366_v15 }
 0x195   : > { %v380_v18 = vadd.f32 %v739_v16, %v373_v17 }
 0x197   : > { %v381_v19 = vpack.c.bf16 %v380_v18, %v380_v18 }
 0x199   : > { %777 = vmatmul.mubr.msk.bf16.vlgmr.msra.gmra.mrb[0].mxu0 %vm352_vm0, %v381_v19 }
 0x26c   : > { %v442_v21 = vpop.f32.mrb[0].mxu0 }
 0x26d   : > { %v443_v22 = vadd.f32 %v740_v20, %v442_v21  ;;  %v778_v23 = vpop.f32.mrb[1].mxu0 }
 0x26e   : > { %v445_v24 = vpop.f32.mrb[2].mxu0 }
 0x26f   : > { %v448_v25 = vpack.c.bf16 %v443_v22, %v443_v22  ;;  %v779_v26 = vpop.f32.mrb[3].mxu0 }
 0x271   : > { %482 = vrot.lane.b32.xlu0 %v448_v25, %s1095_s17  ;;  %454 = vrot.lane.b32.xlu1 %v448_v25, %s1096_s22  ;;  %450 = vst.msk [vmem:[%s1325_s8] sm:$0xf] %vm449_vm2, %v448_v25  ;;  %s340_s17 = scalar_lea.vmem [#allocation8], %s1322_s13 }
 0x272   : > { %s549_s22 = sshll.u32 %s340_s17, 4  ;;  %s1340_s22 = int_to_ptr.vmem [resolvable:$true] %s549_s22 }
 0x275   : > { %492 = vrot.lane.b32.xlu0 %v448_v25, %s1097_s12  ;;  %467 = vrot.lane.b32.xlu1 %v448_v25, %s1098_s20  ;;  %s512_s12 = sand.u32 1, %s1181_s30   ;;  %s1335_s20 = sshll.u32 %s1079_s27, 8 }
 0x276   : > { %s1349_s27 = scalar_lea.sflag [#allocation9], %s512_s12  ;;  %s941_s30 = scalar_lea.vmem %s1340_s22, 256 }
 0x277   : > { %p942_p6 = scmp.ne.s32.totalorder %s1340_s22, %s941_s30 }
 0x279   : > { %497 = vrot.lane.b32.xlu1 %v448_v25, %s1099_s16  ;;  %p943_p8 = pnand %p942_p6, %p1244_p10 }
 0x27b   : > { %p944_p12 = pneg %p943_p8 }
 0x27d   : > { %458 = vrot.lane.b32.xlu1 %v448_v25, %s1100_s3 }
 0x281   : > { %462 = vrot.lane.b32.xlu1 %v448_v25, %s1101_s9 }
 0x285   : > { %472 = vrot.lane.b32.xlu1 %v448_v25, %s1102_s11  ;;  %s1346_s11 = scalar_lea.hbm %s1492_s6, %s1335_s20 }
 0x289   : > { %477 = vrot.lane.b32.xlu1 %v448_v25, %s1103_s18  ;;  %s1106_s18 = smov [#allocation8]  }
 0x28d   : > { %487 = vrot.lane.b32.xlu1 %v448_v25, %s1104_s14  ;;  %s945_s14 = sshll.u32 %s1106_s18, 4  ;;  %s946_s14 = int_to_ptr.vmem [resolvable:$false] %s945_s14 }
 0x28e   : > { %p948_p11 = scmp.lt.s32.totalorder %s1340_s22, %s946_s14 }
 0x291   : > { %502 = vrot.lane.b32.xlu1 %v448_v25, %s1105_s19  ;;  %s947_s19 = scalar_lea.vmem %s946_s14, 512 }
 0x292   : > { %p949_p0 = scmp.lt.s32.totalorder %s947_s19, %s941_s30 }
 0x294   : > { %p950_p5 = por %p949_p0, %p948_p11 }
 0x296   : > { %p951_p9 = pnand %p950_p5, %p944_p12 }
 0x2e3   : > { %v483_v27 = vpop.permute.xlu0 %482  ;;  %v455_v28 = vpop.permute.xlu1 %454 }
 0x2e4   : > { %749 = vst.msk [vmem:[%s340_s17 + $0x8] sm:$0xf] %vm449_vm2, %v483_v27  ;;  %457 = vst.msk [vmem:[%s340_s17] sm:$0xf] %vm449_vm2, %v455_v28 }
 0x2e7   : > { %v493_v29 = vpop.permute.xlu0 %492  ;;  %v468_v30 = vpop.permute.xlu1 %467 }
 0x2e8   : > { %751 = vst.msk [vmem:[%s1325_s8 + $0xc] sm:$0xf] %vm449_vm2, %v493_v29  ;;  %746 = vst.msk [vmem:[%s340_s17 + $0x4] sm:$0xf] %vm449_vm2, %v468_v30 }
 0x2eb   : > { %v498_v31 = vpop.permute.xlu1 %497 }
 0x2ec   : > { %752 = vst.msk [vmem:[%s340_s17 + $0xc] sm:$0xf] %vm449_vm2, %v498_v31 }
 0x2ed   : > { %954 = shalt.err (!%p951_p9)
}
 0x2ee   : > { %s955_s17 = scalar_lea.hbm %s1346_s11, 256  ;;  %s959_s9 = scalar_lea.hbm %s1492_s6, 512 }
 0x2ef   : > { %p956_p1 = scmp.ne.s32.totalorder %s1346_s11, %s955_s17  ;;  %p960_p3 = scmp.lt.u32.totalorder %s1346_s11, %s1492_s6 }
 0x2f0   : > { %p961_p4 = scmp.lt.u32.totalorder %s959_s9, %s955_s17  ;;  %p963_p6 = scmp.lt.u32.totalorder %s955_s17, %s1346_s11 }
 0x2f1   : > { %p957_p2 = pnand %p956_p1, %p1244_p10 }
 0x2f2   : > { %p962_p13 = por %p961_p4, %p960_p3 }
 0x2f3   : > { %p958_p7 = pneg %p957_p2 }
 0x2f4   : > { %p964_p8 = por %p963_p6, %p962_p13 }
 0x2f6   : > { %p965_p12 = pnand %p964_p8, %p958_p7 }
 0x2f8   : > { %968 = shalt.err (!%p965_p12)
}
 0x2f9   : > { %s1107_s30 = smov 4   ;;  %v459_v32 = vpop.permute.xlu1 %458  ;;  %s1377_s19 = scalar_lea.vmem [#allocation10], %s1322_s13 }
 0x2fa   : > { %787 = dma.vmem_to_hbm [thread:$0]  (%p1244_p10), %s1340_s22, 256, %s1346_s11, %s1349_s27, %s1100_s3, %s1100_s3, %s1107_s30  }
 0x2fb   : > { %461 = vst.msk [vmem:[%s1377_s19] sm:$0xf] %vm449_vm2, %v459_v32  ;;  %s532_s17 = sshll.u32 %s1325_s8, 4  ;;  %s1392_s13 = scalar_lea.hbm %s1491_s5, %s1335_s20  ;;  %s1386_s17 = int_to_ptr.vmem [resolvable:$true] %s532_s17 }
 0x2fc   : > { %s969_s11 = scalar_lea.vmem %s1386_s17, 256  ;;  %s1108_s9 = smov [#allocation7]  }
 0x2fd   : > { %v463_v33 = vpop.permute.xlu1 %462  ;;  %p970_p11 = scmp.ne.s32.totalorder %s1386_s17, %s969_s11  ;;  %s973_s18 = sshll.u32 %s1108_s9, 4  ;;  %s974_s18 = int_to_ptr.vmem [resolvable:$false] %s973_s18 }
 0x2fe   : > { %745 = vst.msk [vmem:[%s1325_s8 + $0x4] sm:$0xf] %vm449_vm2, %v463_v33  ;;  %s975_s14 = scalar_lea.vmem %s974_s18, 512  ;;  %p976_p9 = scmp.lt.s32.totalorder %s1386_s17, %s974_s18 }
 0x2ff   : > { %p971_p0 = pnand %p970_p11, %p1244_p10  ;;  %p977_p1 = scmp.lt.s32.totalorder %s975_s14, %s969_s11 }
 0x301   : > { %v473_v34 = vpop.permute.xlu1 %472  ;;  %p972_p5 = pneg %p971_p0  ;;  %p978_p2 = por %p977_p1, %p976_p9 }
 0x302   : > { %747 = vst.msk [vmem:[%s1377_s19 + $0x4] sm:$0xf] %vm449_vm2, %v473_v34 }
 0x303   : > { %p979_p7 = pnand %p978_p2, %p972_p5 }
 0x305   : > { %v478_v35 = vpop.permute.xlu1 %477 }
 0x306   : > { %748 = vst.msk [vmem:[%s1325_s8 + $0x8] sm:$0xf] %vm449_vm2, %v478_v35 }
 0x307   : > { %982 = shalt.err (!%p979_p7)
}
 0x308   : > { %s983_s8 = scalar_lea.hbm %s1392_s13, 256  ;;  %s987_s9 = scalar_lea.hbm %s1491_s5, 512 }
 0x309   : > { %p984_p3 = scmp.ne.s32.totalorder %s1392_s13, %s983_s8  ;;  %p988_p6 = scmp.lt.u32.totalorder %s1392_s13, %s1491_s5 }
 0x30a   : > { %p989_p8 = scmp.lt.u32.totalorder %s987_s9, %s983_s8  ;;  %p991_p11 = scmp.lt.u32.totalorder %s983_s8, %s1392_s13 }
 0x30b   : > { %p985_p4 = pnand %p984_p3, %p1244_p10 }
 0x30c   : > { %p990_p12 = por %p989_p8, %p988_p6 }
 0x30d   : > { %p986_p13 = pneg %p985_p4 }
 0x30e   : > { %p992_p0 = por %p991_p11, %p990_p12 }
 0x310   : > { %p993_p5 = pnand %p992_p0, %p986_p13 }
 0x312   : > { %996 = shalt.err (!%p993_p5)
}
 0x313   : > { %s1514_s11 = scalar_lea.sflag [#allocation4], %s1297_s15  ;;  %s566_s22 = sshll.u32 %s1377_s19, 4  ;;  %v488_v36 = vpop.permute.xlu1 %487  ;;  %s1426_s22 = int_to_ptr.vmem [resolvable:$true] %s566_s22 }
 0x314   : > { %786 = dma.vmem_to_hbm [thread:$0]  (%p1244_p10), %s1386_s17, 256, %s1392_s13, %s1514_s11, %s1100_s3, %s1100_s3, %s1107_s30  }
 0x315   : > { %750 = vst.msk [vmem:[%s1377_s19 + $0x8] sm:$0xf] %vm449_vm2, %v488_v36  ;;  %s1432_s15 = scalar_lea.hbm %s1493_s7, %s1335_s20  ;;  %s997_s12 = scalar_lea.vmem %s1426_s22, 256 }
 0x316   : > { %p998_p9 = scmp.ne.s32.totalorder %s1426_s22, %s997_s12  ;;  %s1109_s17 = smov [#allocation10]  }
 0x317   : > { %v503_v37 = vpop.permute.xlu1 %502  ;;  %s1001_s13 = sshll.u32 %s1109_s17, 4  ;;  %s1002_s13 = int_to_ptr.vmem [resolvable:$false] %s1001_s13 }
 0x318   : > { %753 = vst.msk [vmem:[%s1377_s19 + $0xc] sm:$0xf] %vm449_vm2, %v503_v37  ;;  %p999_p1 = pnand %p998_p9, %p1244_p10  ;;  %s1003_s16 = scalar_lea.vmem %s1002_s13, 512 }
 0x319   : > { %p1004_p7 = scmp.lt.s32.totalorder %s1426_s22, %s1002_s13  ;;  %p1005_p3 = scmp.lt.s32.totalorder %s1003_s16, %s997_s12 }
 0x31a   : > { %p1000_p2 = pneg %p999_p1 }
 0x31b   : > { %p1006_p4 = por %p1005_p3, %p1004_p7 }
 0x31d   : > { %p1007_p13 = pnand %p1006_p4, %p1000_p2 }
 0x31f   : > { %1010 = shalt.err (!%p1007_p13)
}
 0x320   : > { %s1011_s20 = scalar_lea.hbm %s1432_s15, 256  ;;  %s1015_s18 = scalar_lea.hbm %s1493_s7, 512 }
 0x321   : > { %p1012_p6 = scmp.ne.s32.totalorder %s1432_s15, %s1011_s20  ;;  %p1016_p11 = scmp.lt.u32.totalorder %s1432_s15, %s1493_s7 }
 0x322   : > { %p1017_p0 = scmp.lt.u32.totalorder %s1015_s18, %s1011_s20  ;;  %p1019_p9 = scmp.lt.u32.totalorder %s1011_s20, %s1432_s15 }
 0x323   : > { %p1013_p8 = pnand %p1012_p6, %p1244_p10 }
 0x324   : > { %p1018_p5 = por %p1017_p0, %p1016_p11 }
 0x325   : > { %p1014_p12 = pneg %p1013_p8 }
 0x326   : > { %p1020_p1 = por %p1019_p9, %p1018_p5 }
 0x328   : > { %p1021_p2 = pnand %p1020_p1, %p1014_p12 }
 0x32a   : > { %1024 = shalt.err (!%p1021_p2)
}
 0x32b   : > { %788 = dma.vmem_to_hbm [thread:$0]  (%p1244_p10), %s1426_s22, 256, %s1432_s15, %s1349_s27, %s1100_s3, %s1100_s3, %s1107_s30  }
 0x32c PF: > { %s581_s8 = sand.u32 1, %s1067_s24   ;;  %p1515_p7 = scmp.ne.s32.totalorder %s1501_s10, 0 }
 0x32d   : > { %p1516_p3 = scmp.ge.s32.totalorder %s1087_s29, 2  ;;  %s582_s12 = scalar_lea.sflag [#allocation4], %s581_s8 }
 0x32f   : > { %p801_p4 = pnand %p1516_p3, %p1515_p7 }
 0x331   : > { %1058 = dma.done.wait (!%p801_p4), %s582_s12, 256  }
 0x332   : > { %1060 = vsyncadd (!%p801_p4), %s582_s12, 4294967040  ;;  %s1517_s21 = sadd.s32 4294967294, %s1087_s29  }
 0x333   : > { %s590_s17 = sand.u32 1, %s1517_s21  }
 0x334   : > { %s591_s13 = scalar_lea.sflag [#allocation9], %s590_s17 }
 0x335   : > { %1062 = dma.done.wait (!%p801_p4), %s591_s13, 512  }
 0x336   : > { %1064 = vsyncadd (!%p801_p4), %s591_s13, 4294966784  ;;  %s28_s29 = sadd.s32 1, %s1087_s29   ;;  %s1518_s3 = sld [smem:[#allocation15_spill]] }
 0x337   : > { %p25_p10 = scmp.ge.s32.totalorder %s28_s29, 4   ;;  %s1519_s24 = smov %s1071_s25 }
 0x338   : > { %s1520_s25 = smov %s1075_s26  ;;  %s1521_s26 = smov %s1253_s23 }
 0x339   : > { %s1522_s27 = smov %s1083_s28  ;;  %27 = sbr.rel (!%p25_p10) target bundleno = 11 (0xb), region = 130 }
 0x33c   : > { %s1523_s28 = smov %s1518_s3 }
 0x340   :  { %605 = vsyncpa [#allocation3], 1 }
 0x341   :  { %607 = vsyncpa [#allocation3 + $0x1], 1 }
 0x342   :  { %608 = vsyncpa [#allocation6], 1 }
 0x343   :  { %609 = vsyncpa [#allocation4], 1 }
 0x344   :  { %611 = vsyncpa [#allocation4 + $0x1], 1 }
 0x345   :  { %612 = vsyncpa [#allocation9], 1 }
 0x346   :  { %614 = vsyncpa [#allocation9 + $0x1], 1 }

</bundles_post_ra>
